<compile_context>
chip_gen: v5e
topology: v5e:2x2
jax: 0.10.0
libtpu: 0.0.40
codegen_flags: <defaults>
</compile_context>

<pallas_src>
import math
import jax
import jax.numpy as jnp
from jax.experimental import pallas as pl
from jax.experimental.pallas import tpu as pltpu

GROUP_SIZE = 4  # rt_group_size, reflection=False


# -----------------------------------------------------------------------------
# Parameter construction (glue, plain JAX) — mirrors GConv3d parameter shapes for
# spectral=True, Hermitian=True, kernel_size=2*modes-1, kernel_size_T=2*time_modes-1.
# -----------------------------------------------------------------------------
def init_gspectral_params(key, in_channels, out_channels, modes, time_modes,
                          group_size=GROUP_SIZE):
    O, I, G = out_channels, in_channels, group_size
    kY = 2 * modes - 1        # kernel_size_Y
    kX = modes                # Hermitian kernel_size_X
    kT = time_modes           # Hermitian kernel_size_T
    # approximate kaiming_uniform(a=sqrt(5)) scale; exact init distribution is not
    # part of the forward-pass semantics.
    fan_in = I * G * kY * kY * (2 * time_modes - 1)
    bound = math.sqrt(2.0 / (1.0 + 5.0)) * math.sqrt(3.0 / fan_in)
    ks = jax.random.split(key, 7)

    def cpl(k_r, k_i, shape):
        return (jax.random.uniform(k_r, shape, jnp.float32, -bound, bound)
                + 1j * jax.random.uniform(k_i, shape, jnp.float32, -bound, bound)
                ).astype(jnp.complex64)

    return {
        "y00_modes":    cpl(ks[0], ks[1], (O, 1, I, G, kX - 1, 1, 1)),
        "yposx0_modes": cpl(ks[2], ks[3], (O, 1, I, G, kY, kX - 1, 1)),
        "000_modes":    jax.random.uniform(ks[4], (O, 1, I, G, 1, 1, 1),
                                           jnp.float32, -bound, bound),
        "yxpost_modes": cpl(ks[5], ks[6], (O, 1, I, G, kY, kY, kT - 1)),
    }


def build_gspectral_weights(params, modes, time_modes, group_size=GROUP_SIZE,
                            reflection=False):
    """Replicates GConv3d.get_weight() (Hermitian, middle layer) + GSpectralConv3d's
    transpose(0,1). Returns complex64 (in*G, out*G, 2m-1, 2m-1, time_modes)."""
    assert not reflection  # TODO(synk): reflection=True (p4m) permutation not implemented
    G, rt = group_size, 4
    y00 = params["y00_modes"]
    yposx0 = params["yposx0_modes"]
    w000 = params["000_modes"].astype(jnp.complex64)
    yxpost = params["yxpost_modes"]

    # Hermitian conj-symmetric completion; trailing dims are (..., Y, X, T)
    w = jnp.concatenate([jnp.flip(jnp.conj(y00), axis=-3), w000, y00], axis=-3)
    w = jnp.concatenate(
        [jnp.rot90(jnp.conj(yposx0), k=2, axes=(-3, -2)), w, yposx0], axis=-2)
    w = jnp.concatenate(
        [jnp.flip(jnp.rot90(jnp.conj(yxpost), k=2, axes=(-3, -2)), axis=-1), w, yxpost],
        axis=-1)                                  # (O, 1, I, G, 2m-1, 2m-1, 2tm-1)

    # p4 group-circulant expansion: each successive output-group copy is rot90 of the
    # previous one with the input-group axis cyclically shifted by +1.
    copies = [w[:, 0]]                            # (O, I, G, Y, X, T)
    for _ in range(1, rt):
        nxt = jnp.rot90(copies[-1], k=1, axes=(-3, -2))
        nxt = jnp.roll(nxt, shift=1, axis=2)
        copies.append(nxt)
    w = jnp.stack(copies, axis=1)                 # (O, G, I, G, Y, X, T)

    O, I = w.shape[0], w.shape[2]
    kY = 2 * modes - 1
    w = w.reshape(O * G, I * G, kY, kY, 2 * time_modes - 1)
    w = w[..., -time_modes:]                      # Hermitian T truncation
    return jnp.swapaxes(w, 0, 1)                  # (I*G, O*G, kY, kY, time_modes)


# -----------------------------------------------------------------------------
# Pallas kernel: per-mode complex channel contraction
#   out[b, o, m] = sum_i x[b, i, m] * w[i, o, m]        (complex)
# real/imag split; modes (m) on the lane axis.
# -----------------------------------------------------------------------------
def _mode_mix_kernel(xr_ref, xi_ref, wr_ref, wi_ref, or_ref, oi_ref):
    xr = xr_ref[0][:, None, :]        # (Ci, 1, tile_m)
    xi = xi_ref[0][:, None, :]
    wr = wr_ref[...]                  # (Ci, Co, tile_m)
    wi = wi_ref[...]
    or_ref[0] = jnp.sum(xr * wr - xi * wi, axis=0)     # (Co, tile_m)
    oi_ref[0] = jnp.sum(xr * wi + xi * wr, axis=0)


def _mode_mix_pallas(xs_flat, w_flat):
    """xs_flat: (B, Ci, M) complex64, w_flat: (Ci, Co, M) complex64 -> (B, Co, M) complex64."""
    B, Ci, M = xs_flat.shape
    Co = w_flat.shape[1]

    LANE = 128
    m128 = (M + LANE - 1) // LANE
    # keep (real+imag, double-buffered) weight blocks in a few MiB of VMEM
    blk_budget = max(1, (6 * 1024 * 1024) // (Ci * Co * LANE * 16))
    blk = max(1, min(m128, 8, blk_budget))
    tile_m = blk * LANE
    n_mtiles = (m128 + blk - 1) // blk
    M_pad = n_mtiles * tile_m
    pad = M_pad - M

    def prep(z):
        return jnp.pad(z, ((0, 0), (0, 0), (0, pad)))

    xr, xi = prep(jnp.real(xs_flat)), prep(jnp.imag(xs_flat))
    wr, wi = prep(jnp.real(w_flat)), prep(jnp.imag(w_flat))

    out_r, out_i = pl.pallas_call(
        _mode_mix_kernel,
        out_shape=(jax.ShapeDtypeStruct((B, Co, M_pad), jnp.float32),
                   jax.ShapeDtypeStruct((B, Co, M_pad), jnp.float32)),
        grid_spec=pltpu.PrefetchScalarGridSpec(
            num_scalar_prefetch=0,
            grid=(n_mtiles, B),   # batch innermost -> weight blocks stay VMEM-resident
            in_specs=[
                pl.BlockSpec((1, Ci, tile_m), lambda mi, b: (b, 0, mi)),
                pl.BlockSpec((1, Ci, tile_m), lambda mi, b: (b, 0, mi)),
                pl.BlockSpec((Ci, Co, tile_m), lambda mi, b: (0, 0, mi)),
                pl.BlockSpec((Ci, Co, tile_m), lambda mi, b: (0, 0, mi)),
            ],
            out_specs=[
                pl.BlockSpec((1, Co, tile_m), lambda mi, b: (b, 0, mi)),
                pl.BlockSpec((1, Co, tile_m), lambda mi, b: (b, 0, mi)),
            ],
        ),
        compiler_params=pltpu.CompilerParams(
            dimension_semantics=("parallel", "parallel")),
    )(xr, xi, wr, wi)

    return jax.lax.complex(out_r[..., :M], out_i[..., :M])


# -----------------------------------------------------------------------------
# Forward pass (FFT glue in XLA, mode mixing in Pallas)
# -----------------------------------------------------------------------------
def gspectral_forward(x, weights, modes, time_modes):
    """x: (B, in*G, Y, X, T) float32; weights: (in*G, out*G, 2m-1, 2m-1, tm) complex64."""
    B, Ci, Y, X, T = x.shape
    Co = weights.shape[1]
    My, Mx, Mt = weights.shape[2], weights.shape[3], weights.shape[4]
    fy, fx = Y // 2, X // 2   # index of zero frequency after fftshift

    x_ft = jnp.fft.fftshift(jnp.fft.rfftn(x, axes=(-3, -2, -1)), axes=(-3, -2))
    xs = x_ft[..., fy - modes + 1: fy + modes, fx - modes + 1: fx + modes, :time_modes]

    M = My * Mx * Mt
    out_modes = _mode_mix_pallas(xs.reshape(B, Ci, M),
                                 weights.reshape(Ci, Co, M)).reshape(B, Co, My, Mx, Mt)

    # NOTE: PyTorch sizes out_ft with weights.shape[0] (= in*G); G-FNO always uses
    # in_channels == out_channels for this layer, so the counts coincide.
    out_ft = jnp.zeros((B, Co, Y, X, T // 2 + 1), jnp.complex64)
    out_ft = out_ft.at[..., fy - modes + 1: fy + modes,
                       fx - modes + 1: fx + modes, :time_modes].set(out_modes)
    return jnp.fft.irfftn(jnp.fft.ifftshift(out_ft, axes=(-3, -2)),
                          s=(Y, X, T), axes=(-3, -2, -1))


# -----------------------------------------------------------------------------
# Pure-JAX reference (mirrors GSpectralConv3d.forward, complex einsum path)
# -----------------------------------------------------------------------------
def gspectral_reference(x, weights, modes, time_modes):
    B, Ci, Y, X, T = x.shape
    Co = weights.shape[1]
    fy, fx = Y // 2, X // 2
    x_ft = jnp.fft.fftshift(jnp.fft.rfftn(x, axes=(-3, -2, -1)), axes=(-3, -2))
    xs = x_ft[..., fy - modes + 1: fy + modes, fx - modes + 1: fx + modes, :time_modes]
    out_modes = jnp.einsum('bixyz,ioxyz->boxyz', xs, weights)
    out_ft = jnp.zeros((B, Co, Y, X, T // 2 + 1), jnp.complex64)
    out_ft = out_ft.at[..., fy - modes + 1: fy + modes,
                       fx - modes + 1: fx + modes, :time_modes].set(out_modes)
    return jnp.fft.irfftn(jnp.fft.ifftshift(out_ft, axes=(-3, -2)),
                          s=(Y, X, T), axes=(-3, -2, -1))


if __name__ == "__main__":
    # GSpectralConv3d(in_channels=4, out_channels=4, modes=4, time_modes=3, reflection=False)
    in_channels = out_channels = 4
    modes, time_modes = 4, 3
    G = GROUP_SIZE
    Bsz, Y, X, T = 2, 16, 16, 8

    key = jax.random.PRNGKey(0)
    k_x, k_w = jax.random.split(key)

    # Input to the spectral layer carries in_channels * group_size channels.
    x = jax.random.normal(k_x, (Bsz, in_channels * G, Y, X, T), jnp.float32)

    params = init_gspectral_params(k_w, in_channels, out_channels, modes, time_modes)
    weights = build_gspectral_weights(params, modes, time_modes)   # (16,16,7,7,3) c64

    y = jax.block_until_ready(gspectral_forward(x, weights, modes, time_modes))
    y_ref = gspectral_reference(x, weights, modes, time_modes)

    assert y.shape == (Bsz, out_channels * G, Y, X, T), y.shape
    err = float(jnp.max(jnp.abs(y - y_ref)))
    assert jnp.allclose(y, y_ref, rtol=1e-4, atol=1e-4), err
    print("KERNEL_OK")
</pallas_src>

<mosaic_0001>
module attributes {stable_mosaic.version = 11 : i64} {
  func.func @_mode_mix_kernel(%arg0: i32, %arg1: i32, %arg2: memref<1x16x256xf32, #tpu.memory_space<vmem>>, %arg3: memref<1x16x256xf32, #tpu.memory_space<vmem>>, %arg4: memref<16x16x256xf32, #tpu.memory_space<vmem>>, %arg5: memref<16x16x256xf32, #tpu.memory_space<vmem>>, %arg6: memref<1x16x256xf32, #tpu.memory_space<vmem>>, %arg7: memref<1x16x256xf32, #tpu.memory_space<vmem>>) attributes {dimension_semantics = [#tpu.dimension_semantics<parallel>, #tpu.dimension_semantics<parallel>], iteration_bounds = array<i64: 1, 2>, scalar_prefetch = 0 : i64, scratch_operands = 0 : i64, tpu.core_type = #tpu.core_type<tc>, window_params = [{transform_indices = @transform_0, window_bounds = array<i64: 1, 16, 256>}, {transform_indices = @transform_1, window_bounds = array<i64: 1, 16, 256>}, {transform_indices = @transform_2, window_bounds = array<i64: 16, 16, 256>}, {transform_indices = @transform_3, window_bounds = array<i64: 16, 16, 256>}, {transform_indices = @transform_4, window_bounds = array<i64: 1, 16, 256>}, {transform_indices = @transform_5, window_bounds = array<i64: 1, 16, 256>}]} {
    %c0 = arith.constant 0 : index
    %c0_0 = arith.constant 0 : index
    %c0_1 = arith.constant 0 : index
    %0 = vector.load %arg2[%c0, %c0_0, %c0_1] : memref<1x16x256xf32, #tpu.memory_space<vmem>>, vector<1x16x256xf32>
    %1 = vector.shape_cast %0 : vector<1x16x256xf32> to vector<16x256xf32>
    %2 = vector.shape_cast %1 : vector<16x256xf32> to vector<16x1x256xf32>
    %c0_2 = arith.constant 0 : index
    %c0_3 = arith.constant 0 : index
    %c0_4 = arith.constant 0 : index
    %3 = vector.load %arg3[%c0_2, %c0_3, %c0_4] : memref<1x16x256xf32, #tpu.memory_space<vmem>>, vector<1x16x256xf32>
    %4 = vector.shape_cast %3 : vector<1x16x256xf32> to vector<16x256xf32>
    %5 = vector.shape_cast %4 : vector<16x256xf32> to vector<16x1x256xf32>
    %c0_5 = arith.constant 0 : index
    %c0_6 = arith.constant 0 : index
    %c0_7 = arith.constant 0 : index
    %6 = vector.load %arg4[%c0_5, %c0_6, %c0_7] : memref<16x16x256xf32, #tpu.memory_space<vmem>>, vector<16x16x256xf32>
    %c0_8 = arith.constant 0 : index
    %c0_9 = arith.constant 0 : index
    %c0_10 = arith.constant 0 : index
    %7 = vector.load %arg5[%c0_8, %c0_9, %c0_10] : memref<16x16x256xf32, #tpu.memory_space<vmem>>, vector<16x16x256xf32>
    %8 = vector.broadcast %2 : vector<16x1x256xf32> to vector<16x16x256xf32>
    %9 = arith.mulf %8, %6 : vector<16x16x256xf32>
    %10 = vector.broadcast %5 : vector<16x1x256xf32> to vector<16x16x256xf32>
    %11 = arith.mulf %10, %7 : vector<16x16x256xf32>
    %12 = arith.subf %9, %11 : vector<16x16x256xf32>
    %cst = arith.constant dense<0.000000e+00> : vector<16x256xf32>
    %13 = vector.multi_reduction <add>, %12, %cst [0] : vector<16x16x256xf32> to vector<16x256xf32>
    %c0_11 = arith.constant 0 : index
    %c0_12 = arith.constant 0 : index
    %c0_13 = arith.constant 0 : index
    %14 = vector.load %arg6[%c0_11, %c0_12, %c0_13] : memref<1x16x256xf32, #tpu.memory_space<vmem>>, vector<1x16x256xf32>
    %15 = vector.shape_cast %14 : vector<1x16x256xf32> to vector<16x256xf32>
    %16 = vector.shape_cast %13 : vector<16x256xf32> to vector<1x16x256xf32>
    tpu.vector_store %arg6[%c0_11, %c0_12, %c0_13], %16 {strides = array<i32>} : memref<1x16x256xf32, #tpu.memory_space<vmem>>, vector<1x16x256xf32>,
    %17 = vector.broadcast %2 : vector<16x1x256xf32> to vector<16x16x256xf32>
    %18 = arith.mulf %17, %7 : vector<16x16x256xf32>
    %19 = vector.broadcast %5 : vector<16x1x256xf32> to vector<16x16x256xf32>
    %20 = arith.mulf %19, %6 : vector<16x16x256xf32>
    %21 = arith.addf %18, %20 : vector<16x16x256xf32>
    %cst_14 = arith.constant dense<0.000000e+00> : vector<16x256xf32>
    %22 = vector.multi_reduction <add>, %21, %cst_14 [0] : vector<16x16x256xf32> to vector<16x256xf32>
    %c0_15 = arith.constant 0 : index
    %c0_16 = arith.constant 0 : index
    %c0_17 = arith.constant 0 : index
    %23 = vector.load %arg7[%c0_15, %c0_16, %c0_17] : memref<1x16x256xf32, #tpu.memory_space<vmem>>, vector<1x16x256xf32>
    %24 = vector.shape_cast %23 : vector<1x16x256xf32> to vector<16x256xf32>
    %25 = vector.shape_cast %22 : vector<16x256xf32> to vector<1x16x256xf32>
    tpu.vector_store %arg7[%c0_15, %c0_16, %c0_17], %25 {strides = array<i32>} : memref<1x16x256xf32, #tpu.memory_space<vmem>>, vector<1x16x256xf32>,
    return
  }
  func.func @transform_0(%arg0: i32, %arg1: i32) -> (i32, i32, i32) {
    %c0_i32 = arith.constant 0 : i32
    %c0_i32_0 = arith.constant 0 : i32
    return %arg1, %c0_i32, %arg0 : i32, i32, i32
  }
  func.func @transform_1(%arg0: i32, %arg1: i32) -> (i32, i32, i32) {
    %c0_i32 = arith.constant 0 : i32
    %c0_i32_0 = arith.constant 0 : i32
    return %arg1, %c0_i32, %arg0 : i32, i32, i32
  }
  func.func @transform_2(%arg0: i32, %arg1: i32) -> (i32, i32, i32) {
    %c0_i32 = arith.constant 0 : i32
    %c0_i32_0 = arith.constant 0 : i32
    %c0_i32_1 = arith.constant 0 : i32
    return %c0_i32, %c0_i32_0, %arg0 : i32, i32, i32
  }
  func.func @transform_3(%arg0: i32, %arg1: i32) -> (i32, i32, i32) {
    %c0_i32 = arith.constant 0 : i32
    %c0_i32_0 = arith.constant 0 : i32
    %c0_i32_1 = arith.constant 0 : i32
    return %c0_i32, %c0_i32_0, %arg0 : i32, i32, i32
  }
  func.func @transform_4(%arg0: i32, %arg1: i32) -> (i32, i32, i32) {
    %c0_i32 = arith.constant 0 : i32
    %c0_i32_0 = arith.constant 0 : i32
    return %arg1, %c0_i32, %arg0 : i32, i32, i32
  }
  func.func @transform_5(%arg0: i32, %arg1: i32) -> (i32, i32, i32) {
    %c0_i32 = arith.constant 0 : i32
    %c0_i32_0 = arith.constant 0 : i32
    return %arg1, %c0_i32, %arg0 : i32, i32, i32
  }
}

</mosaic_0001>

<bundles_post_ra>
// kernel: tpu_custom_call.1
= control target key start
LH: loop header
LB: loop body
LE: loop exit
PB: predicated region body
PF: predicated region fallthrough
CT: control target
= control target key end

     0   :  { %s3932_s0 = inlined_call_operand.hbm [shape: f32[2,16,256], index: 0, kind: input, shape index: {}]   ;;  %s3933_s1 = inlined_call_operand.hbm [shape: f32[2,16,256], index: 1, kind: input, shape index: {}]   ;;  %s3934_s2 = inlined_call_operand.hbm [shape: f32[16,16,256], index: 2, kind: input, shape index: {}]   ;;  %s3935_s3 = inlined_call_operand.hbm [shape: f32[16,16,256], index: 3, kind: input, shape index: {}]   ;;  %s3936_s4 = inlined_call_operand.hbm [shape: f32[2,16,256], index: 4, kind: output, shape index: {0}]   ;;  %s3937_s5 = inlined_call_operand.hbm [shape: f32[2,16,256], index: 5, kind: output, shape index: {1}]  }
   0x1   :  { %4218 = sst [smem:[#allocation292_spill]] %s3934_s2 }
   0x2   :  { %4219 = sst [smem:[#allocation293_spill]] %s3935_s3 }
   0x3   :  { %11 = vsyncpa [#allocation3], 0 }
   0x4   :  { %13 = vsyncpa [#allocation3 + $0x1], 0 }
   0x5   :  { %14 = vsyncpa [#allocation6], 0 }
   0x6   :  { %16 = vsyncpa [#allocation6 + $0x1], 0 }
   0x7   :  { %17 = vsyncpa [#allocation9], 0 }
   0x8   :  { %18 = vsyncpa [#allocation4], 0 }
   0x9   :  { %20 = vsyncpa [#allocation4 + $0x1], 0 }
   0xa   :  { %21 = vsyncpa [#allocation12], 0 }
   0xb   :  { %23 = vsyncpa [#allocation12 + $0x1], 0  ;;  %s1863_s18 = smov 0   ;;  %s1865_s19 = smov 0  }
   0xc   :  { %s1867_s20 = smov 0   ;;  %s1869_s21 = smov 0  }
   0xd   :  { %s1871_s22 = smov 0   ;;  %s1873_s23 = smov 0  }
   0xe LB: > { %4220 = sst [smem:[#allocation19_spill]] %s1813_s20  ;;  %s1894_s24 = sadd.s32 4294967295, %s1825_s23   ;;  %s1825_s23 = sphi %s1873_s23, %s29_s23   ;;  %s1821_s22 = sphi %s1871_s22, %s4920_s22   ;;  %s1817_s21 = sphi %s1869_s21, %s4919_s21   ;;  %s1813_s20 = sphi %s1867_s20, %s4918_s20   ;;  %s1809_s19 = sphi %s1865_s19, %s4922_s19   ;;  %s1805_s18 = sphi %s1863_s18, %s4921_s18  }
   0xf   : > { %4221 = sst [smem:[#allocation20_spill]] %s1821_s22  ;;  %s1448_s25 = sadd.s32 4294967294, %s1825_s23  }
  0x10   : > { %p63_p0 = scmp.ne.s32.totalorder %s1809_s19, %s1805_s18  ;;  %p64_p1 = scmp.eq.s32.totalorder %s1894_s24, 0 }
  0x11   : > { %p169_p2 = scmp.eq.s32.totalorder %s1894_s24, 1  ;;  %p175_p3 = scmp.eq.s32.totalorder %s1448_s25, 1 }
  0x12   : > { %p1903_p4 = por %p64_p1, %p63_p0  ;;  %p1449_p5 = scmp.ge.s32.totalorder %s1825_s23, 1 }
  0x13   : > { %p1908_p6 = por %p175_p3, %p63_p0  ;;  %p210_p7 = scmp.lt.s32.totalorder %s1825_s23, 3 }
  0x14   : > { %s4224_s2 = sld [smem:[#allocation292_spill]]  ;;  %s1827_s7 = smov [#allocation7]  }
  0x15   : > { %p1916_p8 = pnand %p1449_p5, %p210_p7  ;;  %s226_s8 = sshll.u32 %s1827_s7, 4  ;;  %s227_s8 = int_to_ptr.vmem [resolvable:$true] %s226_s8 }
  0x16   : > { %p1452_p11 = scmp.ge.s32.totalorder %s1825_s23, 2  ;;  %s4226_s3 = sld [smem:[#allocation293_spill]] }
  0x17   : > { %p1494_p9 = pneg %p1916_p8  ;;  %s3938_s12 = smov 256  }
  0x18   : > { %s3940_s13 = smov 16   ;;  %s1830_s14 = smov [#allocation8]  }
  0x19   : > { %p1495_p10 = pnand %p1494_p9, %p64_p1  ;;  %s243_s15 = sshll.u32 %s1830_s14, 4  ;;  %s244_s15 = int_to_ptr.vmem [resolvable:$true] %s243_s15 }
  0x1a   : > { %s224_s30 = sshll.u32 %s4224_s2, 4  ;;  %s38_s16 = sadd.s32 1, %s1821_s22  ;;  %s225_s30 = int_to_ptr.hbm [resolvable:$true] %s224_s30 }
  0x1b   : > { %1497 = dma.hbm_to_vmem [thread:$0]  (!%p1495_p10), %s225_s30, 8192, %s227_s8, [#allocation6], %s3938_s12, %s3938_s12, %s3940_s13  }
  0x1c   : > { %s241_s11 = sshll.u32 %s4226_s3, 4  ;;  %s50_s17 = sadd.s32 1, %s1813_s20  ;;  %s242_s11 = int_to_ptr.hbm [resolvable:$true] %s241_s11 }
  0x1d   : > { %1500 = dma.hbm_to_vmem [thread:$0]  (!%p1495_p10), %s242_s11, 8192, %s244_s15, [#allocation9], %s3938_s12, %s3938_s12, %s3940_s13  }
  0x1e   : > { %p39_p12 = scmp.ge.s32.totalorder %s38_s16, 2  ;;  %p57_p13 = scmp.ne.s32.totalorder %s1813_s20, %s1809_s19 }
  0x1f   : > { %p58_p0 = scmp.eq.s32.totalorder %s1825_s23, 0  ;;  %p1517_p3 = scmp.lt.s32.totalorder %s1825_s23, 2 }
  0x20   : > { %s4924_s16 = smov (%p39_p12, %s38_s16), 0  ;;  %p1948_p7 = por %p169_p2, %p57_p13 }
  0x21   : > { %4227 = sst [smem:[#allocation21_spill]] %s4924_s16  ;;  %p1942_p5 = por %p58_p0, %p57_p13 }
  0x22   : > { %s45_s29 = ssub.s32 %s1821_s22, %s4924_s16  ;;  %s257_s30 = sand.u32 1, %s1813_s20  }
  0x23   : > { %p48_p9 = scmp.eq.s32.totalorder %s45_s29, 0  ;;  %s1453_s7 = sshll.u32 %s257_s30, 5 }
  0x24   : > { %s1474_s8 = sshll.u32 %s1821_s22, 5  ;;  %s261_s12 = scalar_lea.vmem [#allocation2], %s1453_s7 }
  0x25   : > { %s1957_s9 = scalar_select %p48_p9, %s1813_s20, %s50_s17  }
  0x26   : > { %s268_s14 = scalar_lea.hbm %s3932_s0, %s1474_s8  ;;  %s271_s13 = sshll.u32 %s261_s12, 4  ;;  %s272_s13 = int_to_ptr.vmem [resolvable:$true] %s271_s13 }
  0x27   : > { %4230 = sst [smem:[#allocation22_spill]] %s1957_s9  ;;  %s269_s15 = sshll.u32 %s268_s14, 4  ;;  %s270_s15 = int_to_ptr.hbm [resolvable:$true] %s269_s15 }
  0x28   : > { %p1502_p2 = pnand %p1517_p3, %p1942_p5  ;;  %s292_s29 = scalar_lea.hbm %s3933_s1, %s1474_s8 }
  0x29   : > { %s285_s16 = scalar_lea.vmem [#allocation5], %s1453_s7  ;;  %s293_s22 = sshll.u32 %s292_s29, 4  ;;  %s294_s22 = int_to_ptr.hbm [resolvable:$true] %s293_s22 }
  0x2a   : > { %s295_s17 = sshll.u32 %s285_s16, 4  ;;  %s258_s9 = scalar_lea.sflag [#allocation3], %s257_s30  ;;  %s296_s17 = int_to_ptr.vmem [resolvable:$true] %s295_s17 }
  0x2b   : > { %s4231_s20 = smov 16   ;;  %s4232_s10 = smov 256  }
  0x2c   : > { %1504 = dma.hbm_to_vmem [thread:$0]  (!%p1502_p2), %s270_s15, 512, %s272_s13, %s258_s9, %s4232_s10, %s4232_s10, %s4231_s20  }
  0x2d   : > { %s281_s12 = sand.u32 1, %s1825_s23   ;;  %307 = sbr.rel (%p1916_p8) target bundleno = 475 (0x1db), region = 36 }
  0x2e   : > { %s282_s11 = scalar_lea.sflag [#allocation6], %s281_s12 }
  0x2f   : > { %1507 = dma.hbm_to_vmem [thread:$0]  (!%p1502_p2), %s294_s22, 512, %s296_s17, %s282_s11, %s4232_s10, %s4232_s10, %s4231_s20  }
  0x32   : > { %s1979_s2 = sand.u32 1, %s1809_s19  }
  0x33   : > { %s1982_s3 = sshll.u32 %s1979_s2, 5  ;;  %s310_s13 = scalar_lea.sflag [#allocation3], %s1979_s2 }
  0x34   : > { %s313_s16 = scalar_lea.vmem [#allocation2], %s1982_s3 }
  0x35   : > { %1780 = dma.done.wait (%p1903_p4), %s310_s13, 512  }
  0x36   : > { %1782 = vsyncadd (%p1903_p4), %s310_s13, 4294966784  ;;  %s319_s20 = sand.u32 1, %s1894_s24   ;;  %s1992_s6 = scalar_lea.vmem [#allocation5], %s1982_s3 }
  0x37   : > { %s320_s22 = scalar_lea.sflag [#allocation6], %s319_s20 }
  0x38   : > { %1784 = dma.done.wait (%p1903_p4), %s320_s22, 512  }
  0x39   : > { %1786 = vsyncadd (%p1903_p4), %s320_s22, 4294966784 }
  0x3a   : > { %1788 = dma.done.wait (%p64_p1), [#allocation6], 8192  }
  0x3b   : > { %1790 = vsyncadd (%p64_p1), [#allocation6], 4294959104 }
  0x3c   : > { %1792 = dma.done.wait (%p64_p1), [#allocation9], 8192  }
  0x3d   : > { %1794 = vsyncadd (%p64_p1), [#allocation9], 4294959104  ;;  %v378_v0 = vld [vmem:[%s313_s16 + $0x8] sm:$0xff]  ;;  %v377_v2 = vld [vmem:[%s313_s16] sm:$0xff]  ;;  %vm389_vm0 = vcmask 1041409   ;;  %vm392_vm1 = vcmask 1042434  }
  0x3e   : > { %v385_v1 = vrot.slane %v378_v0, 7  ;;  %v380_v3 = vld [vmem:[%s313_s16 + $0x18] sm:$0xff]  ;;  %vm395_vm2 = vcmask 1043459   ;;  %vm398_vm3 = vcmask 1044484   ;;  %vm401_vm4 = vcmask 1045509   ;;  %v426_v6 = vld [vmem:[%s1992_s6 + $0x8] sm:$0xff] }
  0x3f   : > { %vm404_vm5 = vcmask 1046534   ;;  %vm407_vm6 = vcmask 1046528   ;;  %v386_v4 = vrot.slane %v380_v3, 7  ;;  %vm387_vm7 = vcmask 1040384   ;;  %v379_v7 = vld [vmem:[%s313_s16 + $0x10] sm:$0xff]  ;;  %v425_v21 = vld [vmem:[%s1992_s6] sm:$0xff] }
  0x40   : > { %v2007_v5 = vsel %vm389_vm0, %v377_v2, %v385_v1  ;;  %v2011_v8 = vsel %vm392_vm1, %v377_v2, %v385_v1  ;;  %v2014_v9 = vsel %vm395_vm2, %v377_v2, %v385_v1  ;;  %v2017_v10 = vsel %vm398_vm3, %v377_v2, %v385_v1  ;;  %v428_v26 = vld [vmem:[%s1992_s6 + $0x18] sm:$0xff]  ;;  %v427_v43 = vld [vmem:[%s1992_s6 + $0x10] sm:$0xff]  ;;  %v465_v3 = vld [vmem:[#allocation7] sm:$0xff]  ;;  %s1476_s24 = sshll.u32 %s1817_s21, 5  ;;  %s363_s7 = scalar_lea.vmem [#allocation10], %s1982_s3 }
  0x41   : > { %v2020_v11 = vsel %vm401_vm4, %v377_v2, %v385_v1  ;;  %v2023_v12 = vsel %vm404_vm5, %v377_v2, %v385_v1  ;;  %v2026_v13 = vsel %vm407_vm6, %v385_v1, %v377_v2  ;;  %v388_v14 = vsel %vm387_vm7, %v377_v2, %v385_v1  ;;  %v2172_v0 = vld [vmem:[#allocation7 + $0x28] sm:$0xff]  ;;  %v2193_v60 = vld [vmem:[#allocation7 + $0x40] sm:$0xff]  ;;  %v2212_v48 = vld [vmem:[#allocation7 + $0x50] sm:$0xff]  ;;  %s3262_s30 = scalar_lea.hbm %s3936_s4, %s1476_s24  ;;  %s1253_s8 = sshll.u32 %s363_s7, 4  ;;  %s3316_s8 = int_to_ptr.vmem [resolvable:$true] %s1253_s8 }
  0x42   : > { %v391_v15 = vrot.slane %v2007_v5, 1  ;;  %v433_v16 = vrot.slane %v426_v6, 7  ;;  %v394_v17 = vrot.slane %v2011_v8, 2  ;;  %v397_v18 = vrot.slane %v2014_v9, 3  ;;  %4257 = vst [vmem:[#allocation47_spill] sm:$0xff] %v2172_v0  ;;  %v2210_v49 = vld [vmem:[#allocation7 + $0x48] sm:$0xff] }
  0x43   : > { %v400_v19 = vrot.slane %v2017_v10, 4  ;;  %v2034_v20 = vsel %vm389_vm0, %v379_v7, %v386_v4  ;;  %v403_v22 = vrot.slane %v2020_v11, 5  ;;  %v406_v23 = vrot.slane %v2023_v12, 6  ;;  %4264 = vst [vmem:[#allocation54_spill] sm:$0xff] %v2193_v60  ;;  %v2214_v47 = vld [vmem:[#allocation7 + $0x58] sm:$0xff]  ;;  %v2232_v45 = vld [vmem:[#allocation7 + $0x68] sm:$0xff] }
  0x44   : > { %v409_v24 = vrot.slane %v2026_v13, 7  ;;  %v2041_v25 = vsel %vm387_vm7, %v379_v7, %v386_v4  ;;  %v2045_v27 = vsel %vm392_vm1, %v379_v7, %v386_v4  ;;  %v2048_v28 = vsel %vm395_vm2, %v379_v7, %v386_v4  ;;  %4269 = vst [vmem:[#allocation59_spill] sm:$0xff] %v2210_v49  ;;  %v2234_v44 = vld [vmem:[#allocation7 + $0x70] sm:$0xff]  ;;  %v2236_v42 = vld [vmem:[#allocation7 + $0x78] sm:$0xff]  ;;  %s1255_s9 = sshll.u32 %s3262_s30, 4  ;;  %s1234_s14 = scalar_lea.sflag [#allocation4], %s1979_s2  ;;  %s3318_s9 = int_to_ptr.hbm [resolvable:$true] %s1255_s9 }
  0x45   : > { %v2051_v29 = vsel %vm398_vm3, %v379_v7, %v386_v4  ;;  %v2054_v30 = vsel %vm401_vm4, %v379_v7, %v386_v4  ;;  %v412_v31 = vrot.slane %v2034_v20, 1  ;;  %v2058_v32 = vsel %vm404_vm5, %v379_v7, %v386_v4  ;;  %4270 = vst [vmem:[#allocation60_spill] sm:$0xff] %v2212_v48  ;;  %v2260_v20 = vld [vmem:[#allocation7 + $0x98] sm:$0xff]  ;;  %s1713_s15 = sshra.s32 %s3318_s9, 4  ;;  %s1719_s12 = scalar_lea.hbm %s3936_s4, 64  ;;  %s1714_s15 = int_to_ptr.hbm [resolvable:$true] %s1713_s15 }
  0x46   : > { %v2061_v33 = vsel %vm407_vm6, %v386_v4, %v379_v7  ;;  %v2064_v34 = vsel %vm389_vm0, %v425_v21, %v433_v16  ;;  %v434_v35 = vrot.slane %v428_v26, 7  ;;  %v2067_v36 = vsel %vm392_vm1, %v425_v21, %v433_v16  ;;  %v2155_v26 = vld [vmem:[#allocation7 + $0x20] sm:$0xff]  ;;  %4271 = vst [vmem:[#allocation61_spill] sm:$0xff] %v2214_v47  ;;  %s1715_s29 = scalar_lea.hbm %s1714_s15, 32  ;;  %p1720_p10 = scmp.lt.s32.totalorder %s1714_s15, %s3936_s4 }
  0x47   : > { %v2070_v37 = vsel %vm395_vm2, %v425_v21, %v433_v16  ;;  %v2073_v38 = vsel %vm398_vm3, %v425_v21, %v433_v16  ;;  %v414_v39 = vrot.slane %v2045_v27, 2  ;;  %v2083_v46 = vsel %vm387_vm7, %v425_v21, %v433_v16  ;;  %4252 = vst [vmem:[#allocation42_spill] sm:$0xff] %v2155_v26  ;;  %p1716_p1 = scmp.ne.s32.totalorder %s1714_s15, %s1715_s29  ;;  %p1721_p12 = scmp.lt.s32.totalorder %s1719_s12, %s1715_s29 }
  0x48   : > { %v2090_v51 = vsel %vm401_vm4, %v425_v21, %v433_v16  ;;  %v2093_v52 = vsel %vm404_vm5, %v425_v21, %v433_v16  ;;  %v2096_v53 = vsel %vm407_vm6, %v433_v16, %v425_v21  ;;  %v2099_v54 = vsel %vm387_vm7, %v427_v43, %v434_v35  ;;  %v466_v21 = vld [vmem:[#allocation7 + $0x8] sm:$0xff]  ;;  %4277 = vst [vmem:[#allocation67_spill] sm:$0xff] %v2232_v45 }
  0x49   : > { %4233 = vst [vmem:[#allocation23_spill] sm:$0xff] %v2090_v51  ;;  %v2102_v55 = vsel %vm389_vm0, %v427_v43, %v434_v35  ;;  %v2105_v56 = vsel %vm392_vm1, %v427_v43, %v434_v35  ;;  %v2108_v57 = vsel %vm395_vm2, %v427_v43, %v434_v35  ;;  %v2111_v58 = vsel %vm398_vm3, %v427_v43, %v434_v35  ;;  %v2354_v51 = vld [vmem:[#allocation7 + $0x110] sm:$0xff]  ;;  %p1717_p4 = pnand %p1716_p1, %p1948_p7  ;;  %p1722_p13 = por %p1721_p12, %p1720_p10 }
  0x4a   : > { %4234 = vst [vmem:[#allocation24_spill] sm:$0xff] %v2093_v52  ;;  %v2114_v59 = vsel %vm401_vm4, %v427_v43, %v434_v35  ;;  %v2118_v61 = vsel %vm404_vm5, %v427_v43, %v434_v35  ;;  %v2121_v62 = vsel %vm407_vm6, %v434_v35, %v427_v43  ;;  %v2123_v63 = vperm.slane %v388_v14, 0  ;;  %v467_v43 = vld [vmem:[#allocation7 + $0x10] sm:$0xff]  ;;  %v2352_v52 = vld [vmem:[#allocation7 + $0x108] sm:$0xff] }
  0x4b   : > { %4235 = vst [vmem:[#allocation25_spill] sm:$0xff] %v2096_v53  ;;  %v2128_v4 = vperm.slane %v388_v14, 1  ;;  %v2136_v1 = vperm.slane %v391_v15, 0  ;;  %v2138_v2 = vperm.slane %v391_v15, 1  ;;  %v468_v14 = vld [vmem:[#allocation7 + $0x18] sm:$0xff]  ;;  %v2142_v5 = vperm.slane %v394_v17, 0  ;;  %p1718_p8 = pneg %p1717_p4 }
  0x4c   : > { %4236 = vst [vmem:[#allocation26_spill] sm:$0xff] %v2099_v54  ;;  %v2146_v7 = vperm.slane %v394_v17, 1  ;;  %v2150_v16 = vperm.slane %v397_v18, 0  ;;  %v2153_v35 = vmul.f32 %v2123_v63, %v465_v3  ;;  %v2159_v15 = vperm.slane %v397_v18, 1  ;;  %v2330_v54 = vld [vmem:[#allocation7 + $0xf0] sm:$0xff]  ;;  %v2350_v53 = vld [vmem:[#allocation7 + $0x100] sm:$0xff] }
  0x4d   : > { %4237 = vst [vmem:[#allocation27_spill] sm:$0xff] %v2102_v55  ;;  %v2163_v6 = vperm.slane %v400_v19, 0  ;;  %v2167_v8 = vperm.slane %v400_v19, 1  ;;  %v2170_v17 = vmul.f32 %v2128_v4, %v466_v21  ;;  %v2176_v3 = vperm.slane %v403_v22, 0  ;;  %v2189_v19 = vld [vmem:[#allocation7 + $0x30] sm:$0xff]  ;;  %v2191_v21 = vld [vmem:[#allocation7 + $0x38] sm:$0xff]  ;;  %p1723_p0 = pnand %p1722_p13, %p1718_p8 }
  0x4e   : > { %4238 = vst [vmem:[#allocation28_spill] sm:$0xff] %v2105_v56  ;;  %v2180_v9 = vperm.slane %v403_v22, 1  ;;  %v2184_v18 = vperm.slane %v406_v23, 0  ;;  %v2187_v10 = vmul.f32 %v2123_v63, %v467_v43  ;;  %v2197_v50 = vperm.slane %v406_v23, 1  ;;  %v2328_v55 = vld [vmem:[#allocation7 + $0xe8] sm:$0xff] }
  0x4f   : > { %4239 = vst [vmem:[#allocation29_spill] sm:$0xff] %v2108_v57  ;;  %v2201_v11 = vperm.slane %v409_v24, 0  ;;  %v2205_v22 = vperm.slane %v409_v24, 1  ;;  %v2208_v43 = vmul.f32 %v2128_v4, %v468_v14  ;;  %v2217_v12 = vperm.slane %v2041_v25, 0  ;;  %v2230_v14 = vld [vmem:[#allocation7 + $0x60] sm:$0xff]  ;;  %v2306_v57 = vld [vmem:[#allocation7 + $0xd0] sm:$0xff] }
  0x50   : > { %4240 = vst [vmem:[#allocation30_spill] sm:$0xff] %v2111_v58  ;;  %v2220_v23 = vperm.slane %v2041_v25, 1  ;;  %v2224_v13 = vperm.slane %v412_v31, 0  ;;  %v2228_v24 = vmul.f32 %v2136_v1, %v2155_v26  ;;  %v2240_v25 = vperm.slane %v412_v31, 1  ;;  %v2304_v58 = vld [vmem:[#allocation7 + $0xc8] sm:$0xff] }
  0x51   : > { %4241 = vst [vmem:[#allocation31_spill] sm:$0xff] %v2114_v59  ;;  %v2244_v41 = vperm.slane %v414_v39, 0  ;;  %v2248_v40 = vperm.slane %v414_v39, 1  ;;  %v2252_v26 = vmul.f32 %v2138_v2, %v2172_v0  ;;  %v4288_v31 = vrot.slane %v2048_v28, 3 }
  0x52   : > { %4242 = vst [vmem:[#allocation32_spill] sm:$0xff] %v2118_v61  ;;  %v4301_v61 = vrot.slane %v2054_v30, 5  ;;  %v4314_v56 = vrot.slane %v2061_v33, 7  ;;  %v2358_v33 = vmul.f32 %v2150_v16, %v2230_v14 }
  0x53   : > { %4243 = vst [vmem:[#allocation33_spill] sm:$0xff] %v2121_v62  ;;  %v4290_v27 = vmov %v4288_v31  ;;  %v2282_v62 = vld [vmem:[#allocation7 + $0xb0] sm:$0xff] }
  0x54   : > { %4244 = vst [vmem:[#allocation34_spill] sm:$0xff] %v2123_v63  ;;  %v2256_v63 = vld [vmem:[#allocation7 + $0x88] sm:$0xff]  ;;  %v2268_v39 = vperm.slane %v4290_v27, 1  ;;  %v4303_v59 = vmov %v4301_v61 }
  0x55   : > { %4245 = vst [vmem:[#allocation35_spill] sm:$0xff] %v2128_v4  ;;  %v2254_v4 = vld [vmem:[#allocation7 + $0x80] sm:$0xff] }
  0x56   : > { %4246 = vst [vmem:[#allocation36_spill] sm:$0xff] %v2136_v1 }
  0x57   : > { %4247 = vst [vmem:[#allocation37_spill] sm:$0xff] %v2138_v2 }
  0x58   : > { %4248 = vst [vmem:[#allocation38_spill] sm:$0xff] %v2142_v5 }
  0x59   : > { %4249 = vst [vmem:[#allocation39_spill] sm:$0xff] %v2146_v7 }
  0x5a   : > { %4250 = vst [vmem:[#allocation40_spill] sm:$0xff] %v2150_v16 }
  0x5b   : > { %4251 = vst [vmem:[#allocation41_spill] sm:$0xff] %v2153_v35  ;;  %v2280_v35 = vld [vmem:[#allocation7 + $0xa8] sm:$0xff] }
  0x5c   : > { %4253 = vst [vmem:[#allocation43_spill] sm:$0xff] %v2159_v15 }
  0x5d   : > { %4254 = vst [vmem:[#allocation44_spill] sm:$0xff] %v2163_v6 }
  0x5e   : > { %4255 = vst [vmem:[#allocation45_spill] sm:$0xff] %v2167_v8 }
  0x5f   : > { %4256 = vst [vmem:[#allocation46_spill] sm:$0xff] %v2170_v17  ;;  %v2278_v17 = vld [vmem:[#allocation7 + $0xa0] sm:$0xff] }
  0x60   : > { %4258 = vst [vmem:[#allocation48_spill] sm:$0xff] %v2176_v3 }
  0x61   : > { %4259 = vst [vmem:[#allocation49_spill] sm:$0xff] %v2180_v9 }
  0x62   : > { %4260 = vst [vmem:[#allocation50_spill] sm:$0xff] %v2184_v18 }
  0x63   : > { %4261 = vst [vmem:[#allocation51_spill] sm:$0xff] %v2187_v10  ;;  %v4292_v10 = vrot.slane %v2051_v29, 4  ;;  %v2308_v29 = vld [vmem:[#allocation7 + $0xd8] sm:$0xff] }
  0x64   : > { %4262 = vst [vmem:[#allocation52_spill] sm:$0xff] %v2189_v19 }
  0x65   : > { %4263 = vst [vmem:[#allocation53_spill] sm:$0xff] %v2191_v21  ;;  %v2272_v0 = vperm.slane %v4292_v10, 0  ;;  %v4299_v28 = vmov %v4292_v10  ;;  %v2292_v10 = vperm.slane %v4301_v61, 0 }
  0x66   : > { %4265 = vst [vmem:[#allocation55_spill] sm:$0xff] %v2197_v50  ;;  %v2288_v27 = vperm.slane %v4299_v28, 1  ;;  %v4310_v28 = vrot.slane %v2058_v32, 6  ;;  %v4321_v32 = vmov %v4314_v56 }
  0x67   : > { %4266 = vst [vmem:[#allocation56_spill] sm:$0xff] %v2201_v11 }
  0x68   : > { %4267 = vst [vmem:[#allocation57_spill] sm:$0xff] %v2205_v22  ;;  %v2312_v61 = vperm.slane %v4310_v28, 0  ;;  %v4312_v30 = vmov %v4310_v28  ;;  %v2332_v28 = vld [vmem:[#allocation7 + $0xf8] sm:$0xff] }
  0x69   : > { %4268 = vst [vmem:[#allocation58_spill] sm:$0xff] %v2208_v43  ;;  %v2258_v43 = vld [vmem:[#allocation7 + $0x90] sm:$0xff] }
  0x6a   : > { %4272 = vst [vmem:[#allocation62_spill] sm:$0xff] %v2217_v12 }
  0x6b   : > { %4273 = vst [vmem:[#allocation63_spill] sm:$0xff] %v2220_v23 }
  0x6c   : > { %4274 = vst [vmem:[#allocation64_spill] sm:$0xff] %v2224_v13 }
  0x6d   : > { %4275 = vst [vmem:[#allocation65_spill] sm:$0xff] %v2228_v24  ;;  %v2264_v24 = vperm.slane %v4288_v31, 0  ;;  %v2284_v31 = vld [vmem:[#allocation7 + $0xb8] sm:$0xff] }
  0x6e   : > { %4276 = vst [vmem:[#allocation66_spill] sm:$0xff] %v2230_v14  ;;  %v2380_v14 = vmul.f32 %v2163_v6, %v2254_v4 }
  0x6f   : > { %4278 = vst [vmem:[#allocation68_spill] sm:$0xff] %v2234_v44 }
  0x70   : > { %4279 = vst [vmem:[#allocation69_spill] sm:$0xff] %v2236_v42 }
  0x71   : > { %4280 = vst [vmem:[#allocation70_spill] sm:$0xff] %v2240_v25 }
  0x72   : > { %4281 = vst [vmem:[#allocation71_spill] sm:$0xff] %v2244_v41 }
  0x73   : > { %4282 = vst [vmem:[#allocation72_spill] sm:$0xff] %v2248_v40 }
  0x74   : > { %4283 = vst [vmem:[#allocation73_spill] sm:$0xff] %v2252_v26  ;;  %v2276_v26 = vmul.f32 %v2136_v1, %v2189_v19  ;;  %v2296_v19 = vperm.slane %v4303_v59, 1  ;;  %v2300_v1 = vmul.f32 %v2138_v2, %v2191_v21  ;;  %v2316_v59 = vperm.slane %v4312_v30, 1 }
  0x75   : > { %4284 = vst [vmem:[#allocation74_spill] sm:$0xff] %v2254_v4  ;;  %v2320_v21 = vperm.slane %v4314_v56, 0  ;;  %v2324_v2 = vmul.f32 %v2142_v5, %v2193_v60  ;;  %v2336_v30 = vperm.slane %v4321_v32, 1  ;;  %v2340_v56 = vmul.f32 %v2146_v7, %v2210_v49  ;;  %v2372_v49 = vld [vmem:[#allocation7 + $0x118] sm:$0xff] }
  0x76   : > { %4285 = vst [vmem:[#allocation75_spill] sm:$0xff] %v2256_v63  ;;  %v2344_v60 = vmul.f32 %v2142_v5, %v2212_v48  ;;  %v2362_v32 = vmul.f32 %v2159_v15, %v2232_v45  ;;  %v2366_v48 = vmul.f32 %v2150_v16, %v2234_v44  ;;  %v2376_v5 = vld [vmem:[#allocation7 + $0x128] sm:$0xff]  ;;  %v2384_v45 = vmul.f32 %v2167_v8, %v2256_v63  ;;  %v2396_v16 = vld [vmem:[#allocation7 + $0x138] sm:$0xff] }
  0x77   : > { %4286 = vst [vmem:[#allocation76_spill] sm:$0xff] %v2258_v43  ;;  %v2388_v44 = vmul.f32 %v2163_v6, %v2258_v43  ;;  %v2402_v4 = vmul.f32 %v2176_v3, %v2278_v17  ;;  %v2406_v63 = vmul.f32 %v2180_v9, %v2280_v35  ;;  %v2410_v43 = vmul.f32 %v2176_v3, %v2282_v62  ;;  %v2418_v6 = vld [vmem:[#allocation7 + $0x150] sm:$0xff]  ;;  %v2440_v3 = vld [vmem:[#allocation7 + $0x168] sm:$0xff] }
  0x78   : > { %4287 = vst [vmem:[#allocation77_spill] sm:$0xff] %v2260_v20 }
  0x79   : > { %4289 = vst [vmem:[#allocation78_spill] sm:$0xff] %v2264_v24 }
  0x7a   : > { %4291 = vst [vmem:[#allocation79_spill] sm:$0xff] %v2268_v39 }
  0x7b   : > { %4293 = vst [vmem:[#allocation80_spill] sm:$0xff] %v2272_v0 }
  0x7c   : > { %4294 = vst [vmem:[#allocation81_spill] sm:$0xff] %v2276_v26  ;;  %v2302_v26 = vld [vmem:[#allocation7 + $0xc0] sm:$0xff] }
  0x7d   : > { %4295 = vst [vmem:[#allocation82_spill] sm:$0xff] %v2278_v17  ;;  %v2424_v17 = vmul.f32 %v2184_v18, %v2302_v26 }
  0x7e   : > { %4296 = vst [vmem:[#allocation83_spill] sm:$0xff] %v2280_v35  ;;  %v2428_v35 = vmul.f32 %v2197_v50, %v2304_v58 }
  0x7f   : > { %4297 = vst [vmem:[#allocation84_spill] sm:$0xff] %v2282_v62  ;;  %v2432_v62 = vmul.f32 %v2184_v18, %v2306_v57  ;;  %v2462_v18 = vld [vmem:[#allocation7 + $0x180] sm:$0xff] }
  0x80   : > { %4298 = vst [vmem:[#allocation85_spill] sm:$0xff] %v2284_v31 }
  0x81   : > { %4300 = vst [vmem:[#allocation86_spill] sm:$0xff] %v2288_v27 }
  0x82   : > { %4302 = vst [vmem:[#allocation87_spill] sm:$0xff] %v2292_v10 }
  0x83   : > { %4304 = vst [vmem:[#allocation88_spill] sm:$0xff] %v2296_v19 }
  0x84   : > { %4305 = vst [vmem:[#allocation89_spill] sm:$0xff] %v2300_v1  ;;  %v2326_v1 = vld [vmem:[#allocation7 + $0xe0] sm:$0xff] }
  0x85   : > { %4306 = vst [vmem:[#allocation90_spill] sm:$0xff] %v2302_v26  ;;  %v2446_v26 = vmul.f32 %v2201_v11, %v2326_v1 }
  0x86   : > { %4307 = vst [vmem:[#allocation91_spill] sm:$0xff] %v2304_v58  ;;  %v2450_v58 = vmul.f32 %v2205_v22, %v2328_v55 }
  0x87   : > { %4308 = vst [vmem:[#allocation92_spill] sm:$0xff] %v2306_v57  ;;  %v2454_v57 = vmul.f32 %v2201_v11, %v2330_v54  ;;  %v2484_v11 = vld [vmem:[#allocation7 + $0x198] sm:$0xff] }
  0x88   : > { %4309 = vst [vmem:[#allocation93_spill] sm:$0xff] %v2308_v29 }
  0x89   : > { %4311 = vst [vmem:[#allocation94_spill] sm:$0xff] %v2312_v61 }
  0x8a   : > { %4313 = vst [vmem:[#allocation95_spill] sm:$0xff] %v2316_v59 }
  0x8b   : > { %4315 = vst [vmem:[#allocation96_spill] sm:$0xff] %v2320_v21 }
  0x8c   : > { %4316 = vst [vmem:[#allocation97_spill] sm:$0xff] %v2324_v2  ;;  %v2348_v2 = vmul.f32 %v2146_v7, %v2214_v47  ;;  %v2370_v47 = vmul.f32 %v2159_v15, %v2236_v42  ;;  %v2374_v7 = vld [vmem:[#allocation7 + $0x120] sm:$0xff]  ;;  %v2392_v42 = vmul.f32 %v2167_v8, %v2260_v20  ;;  %v2394_v15 = vld [vmem:[#allocation7 + $0x130] sm:$0xff]  ;;  %v2414_v20 = vmul.f32 %v2180_v9, %v2284_v31  ;;  %v2416_v8 = vld [vmem:[#allocation7 + $0x148] sm:$0xff] }
  0x8d   : > { %4317 = vst [vmem:[#allocation98_spill] sm:$0xff] %v2326_v1  ;;  %v2436_v31 = vmul.f32 %v2197_v50, %v2308_v29  ;;  %v2438_v9 = vld [vmem:[#allocation7 + $0x160] sm:$0xff]  ;;  %v2458_v29 = vmul.f32 %v2205_v22, %v2332_v28  ;;  %v2460_v50 = vld [vmem:[#allocation7 + $0x178] sm:$0xff]  ;;  %v2468_v1 = vmul.f32 %v2217_v12, %v2350_v53  ;;  %v2482_v22 = vld [vmem:[#allocation7 + $0x190] sm:$0xff] }
  0x8e   : > { %4318 = vst [vmem:[#allocation99_spill] sm:$0xff] %v2328_v55  ;;  %v2472_v55 = vmul.f32 %v2220_v23, %v2352_v52 }
  0x8f   : > { %4319 = vst [vmem:[#allocation100_spill] sm:$0xff] %v2330_v54  ;;  %v2476_v54 = vmul.f32 %v2217_v12, %v2354_v51  ;;  %v2506_v12 = vld [vmem:[#allocation7 + $0x1b0] sm:$0xff] }
  0x90   : > { %4320 = vst [vmem:[#allocation101_spill] sm:$0xff] %v2332_v28  ;;  %v2480_v28 = vmul.f32 %v2220_v23, %v2372_v49  ;;  %v2504_v23 = vld [vmem:[#allocation7 + $0x1a8] sm:$0xff] }
  0x91   : > { %4322 = vst [vmem:[#allocation102_spill] sm:$0xff] %v2336_v30 }
  0x92   : > { %4323 = vst [vmem:[#allocation103_spill] sm:$0xff] %v2340_v56  ;;  %v2814_v56 = vld [vmem:[#allocation8 + $0xd0] sm:$0xff] }
  0x93   : > { %4324 = vst [vmem:[#allocation104_spill] sm:$0xff] %v2344_v60  ;;  %v2812_v60 = vld [vmem:[#allocation8 + $0xc8] sm:$0xff] }
  0x94   : > { %4325 = vst [vmem:[#allocation105_spill] sm:$0xff] %v2348_v2  ;;  %v2810_v2 = vld [vmem:[#allocation8 + $0xc0] sm:$0xff] }
  0x95   : > { %4326 = vst [vmem:[#allocation106_spill] sm:$0xff] %v2350_v53  ;;  %v2490_v53 = vmul.f32 %v2224_v13, %v2374_v7 }
  0x96   : > { %4327 = vst [vmem:[#allocation107_spill] sm:$0xff] %v2352_v52  ;;  %v2494_v52 = vmul.f32 %v2240_v25, %v2376_v5 }
  0x97   : > { %4328 = vst [vmem:[#allocation108_spill] sm:$0xff] %v2354_v51  ;;  %v2498_v51 = vmul.f32 %v2224_v13, %v2394_v15  ;;  %v2528_v13 = vld [vmem:[#allocation7 + $0x1c8] sm:$0xff] }
  0x98   : > { %4329 = vst [vmem:[#allocation109_spill] sm:$0xff] %v2358_v33 }
  0x99   : > { %4330 = vst [vmem:[#allocation110_spill] sm:$0xff] %v2362_v32  ;;  %v4500_v32 = vld [vmem:[#allocation33_spill] sm:$0xff] }
  0x9a   : > { %4331 = vst [vmem:[#allocation111_spill] sm:$0xff] %v2366_v48  ;;  %v2790_v48 = vld [vmem:[#allocation8 + $0xb0] sm:$0xff] }
  0x9b   : > { %4332 = vst [vmem:[#allocation112_spill] sm:$0xff] %v2370_v47  ;;  %v2398_v47 = vld [vmem:[#allocation7 + $0x140] sm:$0xff] }
  0x9c   : > { %4333 = vst [vmem:[#allocation113_spill] sm:$0xff] %v2372_v49  ;;  %v2502_v49 = vmul.f32 %v2240_v25, %v2396_v16  ;;  %v2526_v25 = vld [vmem:[#allocation7 + $0x1c0] sm:$0xff] }
  0x9d   : > { %4334 = vst [vmem:[#allocation114_spill] sm:$0xff] %v2374_v7  ;;  %v2512_v7 = vmul.f32 %v2244_v41, %v2398_v47 }
  0x9e   : > { %4335 = vst [vmem:[#allocation115_spill] sm:$0xff] %v2376_v5  ;;  %v2516_v5 = vmul.f32 %v2248_v40, %v2416_v8 }
  0x9f   : > { %4336 = vst [vmem:[#allocation116_spill] sm:$0xff] %v2380_v14  ;;  %v2788_v14 = vld [vmem:[#allocation8 + $0xa8] sm:$0xff] }
  0xa0   : > { %4337 = vst [vmem:[#allocation117_spill] sm:$0xff] %v2384_v45  ;;  %v2786_v45 = vld [vmem:[#allocation8 + $0xa0] sm:$0xff] }
  0xa1   : > { %4338 = vst [vmem:[#allocation118_spill] sm:$0xff] %v2388_v44 }
  0xa2   : > { %4339 = vst [vmem:[#allocation119_spill] sm:$0xff] %v2392_v42  ;;  %v2420_v42 = vld [vmem:[#allocation7 + $0x158] sm:$0xff] }
  0xa3   : > { %4340 = vst [vmem:[#allocation120_spill] sm:$0xff] %v2394_v15  ;;  %v2520_v15 = vmul.f32 %v2244_v41, %v2418_v6  ;;  %v2550_v41 = vld [vmem:[#allocation7 + $0x1e0] sm:$0xff] }
  0xa4   : > { %4341 = vst [vmem:[#allocation121_spill] sm:$0xff] %v2396_v16  ;;  %v2524_v16 = vmul.f32 %v2248_v40, %v2420_v42  ;;  %v2548_v40 = vld [vmem:[#allocation7 + $0x1d8] sm:$0xff] }
  0xa5   : > { %4342 = vst [vmem:[#allocation122_spill] sm:$0xff] %v2398_v47  ;;  %v2534_v47 = vmul.f32 %v2264_v24, %v2438_v9 }
  0xa6   : > { %4343 = vst [vmem:[#allocation123_spill] sm:$0xff] %v2402_v4 }
  0xa7   : > { %4344 = vst [vmem:[#allocation124_spill] sm:$0xff] %v2406_v63  ;;  %v4491_v63 = vld [vmem:[#allocation32_spill] sm:$0xff] }
  0xa8   : > { %4345 = vst [vmem:[#allocation125_spill] sm:$0xff] %v2410_v43 }
  0xa9   : > { %4346 = vst [vmem:[#allocation126_spill] sm:$0xff] %v2414_v20  ;;  %v2442_v20 = vld [vmem:[#allocation7 + $0x170] sm:$0xff] }
  0xaa   : > { %4347 = vst [vmem:[#allocation127_spill] sm:$0xff] %v2416_v8  ;;  %v2538_v8 = vmul.f32 %v2268_v39, %v2440_v3 }
  0xab   : > { %4348 = vst [vmem:[#allocation128_spill] sm:$0xff] %v2418_v6  ;;  %v2542_v6 = vmul.f32 %v2264_v24, %v2442_v20  ;;  %v2572_v24 = vld [vmem:[#allocation7 + $0x1f8] sm:$0xff] }
  0xac   : > { %4349 = vst [vmem:[#allocation129_spill] sm:$0xff] %v2420_v42  ;;  %v2546_v42 = vmul.f32 %v2268_v39, %v2460_v50  ;;  %v2570_v39 = vld [vmem:[#allocation7 + $0x1f0] sm:$0xff] }
  0xad   : > { %4350 = vst [vmem:[#allocation130_spill] sm:$0xff] %v2424_v17  ;;  %v4486_v17 = vld [vmem:[#allocation31_spill] sm:$0xff] }
  0xae   : > { %4351 = vst [vmem:[#allocation131_spill] sm:$0xff] %v2428_v35  ;;  %v2766_v35 = vld [vmem:[#allocation8 + $0x90] sm:$0xff] }
  0xaf   : > { %4352 = vst [vmem:[#allocation132_spill] sm:$0xff] %v2432_v62  ;;  %v2764_v62 = vld [vmem:[#allocation8 + $0x88] sm:$0xff] }
  0xb0   : > { %4353 = vst [vmem:[#allocation133_spill] sm:$0xff] %v2436_v31  ;;  %v2464_v31 = vld [vmem:[#allocation7 + $0x188] sm:$0xff] }
  0xb1   : > { %4354 = vst [vmem:[#allocation134_spill] sm:$0xff] %v2438_v9  ;;  %v2556_v9 = vmul.f32 %v2272_v0, %v2462_v18 }
  0xb2   : > { %4355 = vst [vmem:[#allocation135_spill] sm:$0xff] %v2440_v3  ;;  %v2560_v3 = vmul.f32 %v2288_v27, %v2464_v31 }
  0xb3   : > { %4356 = vst [vmem:[#allocation136_spill] sm:$0xff] %v2442_v20  ;;  %v2564_v20 = vmul.f32 %v2272_v0, %v2482_v22  ;;  %v2603_v0 = vperm.slane %v2083_v46, 0 }
  0xb4   : > { %4357 = vst [vmem:[#allocation137_spill] sm:$0xff] %v2446_v26  ;;  %v2762_v26 = vld [vmem:[#allocation8 + $0x80] sm:$0xff] }
  0xb5   : > { %4358 = vst [vmem:[#allocation138_spill] sm:$0xff] %v2450_v58 }
  0xb6   : > { %4359 = vst [vmem:[#allocation139_spill] sm:$0xff] %v2454_v57 }
  0xb7   : > { %4360 = vst [vmem:[#allocation140_spill] sm:$0xff] %v2458_v29  ;;  %v2486_v29 = vld [vmem:[#allocation7 + $0x1a0] sm:$0xff] }
  0xb8   : > { %4361 = vst [vmem:[#allocation141_spill] sm:$0xff] %v2460_v50  ;;  %v2568_v50 = vmul.f32 %v2288_v27, %v2484_v11  ;;  %v2592_v27 = vmul.f32 %v2312_v61, %v2526_v25 }
  0xb9   : > { %4362 = vst [vmem:[#allocation142_spill] sm:$0xff] %v2462_v18  ;;  %v2576_v18 = vmul.f32 %v2292_v10, %v2486_v29 }
  0xba   : > { %4363 = vst [vmem:[#allocation143_spill] sm:$0xff] %v2464_v31  ;;  %v2580_v31 = vmul.f32 %v2296_v19, %v2504_v23 }
  0xbb   : > { %4364 = vst [vmem:[#allocation144_spill] sm:$0xff] %v2468_v1  ;;  %v4477_v1 = vld [vmem:[#allocation30_spill] sm:$0xff] }
  0xbc   : > { %4365 = vst [vmem:[#allocation145_spill] sm:$0xff] %v2472_v55 }
  0xbd   : > { %4366 = vst [vmem:[#allocation146_spill] sm:$0xff] %v2476_v54  ;;  %v4472_v54 = vld [vmem:[#allocation29_spill] sm:$0xff] }
  0xbe   : > { %4367 = vst [vmem:[#allocation147_spill] sm:$0xff] %v2480_v28  ;;  %v2508_v28 = vld [vmem:[#allocation7 + $0x1b8] sm:$0xff] }
  0xbf   : > { %4368 = vst [vmem:[#allocation148_spill] sm:$0xff] %v2482_v22  ;;  %v2584_v22 = vmul.f32 %v2292_v10, %v2506_v12 }
  0xc0   : > { %4369 = vst [vmem:[#allocation149_spill] sm:$0xff] %v2484_v11  ;;  %v2588_v11 = vmul.f32 %v2296_v19, %v2508_v28  ;;  %v2626_v19 = vmul.f32 %v2320_v21, %v2570_v39 }
  0xc1   : > { %4370 = vst [vmem:[#allocation150_spill] sm:$0xff] %v2486_v29  ;;  %v2596_v29 = vmul.f32 %v2316_v59, %v2528_v13 }
  0xc2   : > { %4371 = vst [vmem:[#allocation151_spill] sm:$0xff] %v2490_v53  ;;  %v2742_v53 = vld [vmem:[#allocation8 + $0x70] sm:$0xff] }
  0xc3   : > { %4372 = vst [vmem:[#allocation152_spill] sm:$0xff] %v2494_v52  ;;  %v2740_v52 = vld [vmem:[#allocation8 + $0x68] sm:$0xff] }
  0xc4   : > { %4373 = vst [vmem:[#allocation153_spill] sm:$0xff] %v2498_v51  ;;  %v2738_v51 = vld [vmem:[#allocation8 + $0x60] sm:$0xff] }
  0xc5   : > { %4374 = vst [vmem:[#allocation154_spill] sm:$0xff] %v2502_v49  ;;  %v2530_v49 = vld [vmem:[#allocation7 + $0x1d0] sm:$0xff] }
  0xc6   : > { %4375 = vst [vmem:[#allocation155_spill] sm:$0xff] %v2504_v23  ;;  %v2600_v23 = vmul.f32 %v2312_v61, %v2530_v49  ;;  %v2622_v61 = vld [vmem:[#allocation8 + $0x8] sm:$0xff] }
  0xc7   : > { %4376 = vst [vmem:[#allocation156_spill] sm:$0xff] %v2506_v12  ;;  %v2605_v12 = vld [vmem:[#allocation8] sm:$0xff] }
  0xc8   : > { %4377 = vst [vmem:[#allocation157_spill] sm:$0xff] %v2508_v28  ;;  %v2609_v28 = vmul.f32 %v2316_v59, %v2548_v40 }
  0xc9   : > { %4378 = vst [vmem:[#allocation158_spill] sm:$0xff] %v2512_v7 }
  0xca   : > { %4379 = vst [vmem:[#allocation159_spill] sm:$0xff] %v2516_v5 }
  0xcb   : > { %4380 = vst [vmem:[#allocation160_spill] sm:$0xff] %v2520_v15 }
  0xcc   : > { %4381 = vst [vmem:[#allocation161_spill] sm:$0xff] %v2524_v16  ;;  %v2552_v16 = vld [vmem:[#allocation7 + $0x1e8] sm:$0xff] }
  0xcd   : > { %4382 = vst [vmem:[#allocation162_spill] sm:$0xff] %v2526_v25  ;;  %v2613_v25 = vmul.f32 %v2320_v21, %v2550_v41  ;;  %v4422_v21 = vrot.slane %v2070_v37, 3  ;;  %v2674_v37 = vld [vmem:[#allocation8 + $0x18] sm:$0xff] }
  0xce   : > { %4383 = vst [vmem:[#allocation163_spill] sm:$0xff] %v2528_v13  ;;  %v2617_v13 = vmul.f32 %v2336_v30, %v2552_v16 }
  0xcf   : > { %4384 = vst [vmem:[#allocation164_spill] sm:$0xff] %v2530_v49  ;;  %v2620_v49 = vperm.slane %v2083_v46, 1  ;;  %v4418_v46 = vrot.slane %v2067_v36, 2 }
  0xd0   : > { %4385 = vst [vmem:[#allocation165_spill] sm:$0xff] %v2534_v47  ;;  %v4463_v47 = vld [vmem:[#allocation28_spill] sm:$0xff] }
  0xd1   : > { %4386 = vst [vmem:[#allocation166_spill] sm:$0xff] %v2538_v8  ;;  %v4464_v15 = vrot.slane %v4463_v47, 2  ;;  %v4478_v47 = vrot.slane %v4477_v1, 4  ;;  %v4492_v1 = vrot.slane %v4491_v63, 6 }
  0xd2   : > { %4387 = vst [vmem:[#allocation167_spill] sm:$0xff] %v2542_v6 }
  0xd3   : > { %4388 = vst [vmem:[#allocation168_spill] sm:$0xff] %v2546_v42  ;;  %v2720_v42 = vld [vmem:[#allocation8 + $0x58] sm:$0xff]  ;;  %v4466_v5 = vmov %v4464_v15  ;;  %v4480_v57 = vmov %v4478_v47  ;;  %v4494_v4 = vmov %v4492_v1 }
  0xd4   : > { %4389 = vst [vmem:[#allocation169_spill] sm:$0xff] %v2548_v40  ;;  %v2630_v40 = vmul.f32 %v2336_v30, %v2572_v24  ;;  %v4424_v30 = vmov %v4422_v21  ;;  %v2736_v7 = vperm.slane %v4466_v5, 1  ;;  %v2756_v5 = vperm.slane %v4478_v47, 0 }
  0xd5   : > { %4390 = vst [vmem:[#allocation170_spill] sm:$0xff] %v2550_v41  ;;  %v4414_v41 = vrot.slane %v2064_v34, 1  ;;  %v4426_v34 = vrot.slane %v2073_v38, 4  ;;  %v2760_v58 = vperm.slane %v4480_v57, 1  ;;  %v2780_v57 = vperm.slane %v4492_v1, 0 }
  0xd6   : > { %4391 = vst [vmem:[#allocation171_spill] sm:$0xff] %v2552_v16  ;;  %v2784_v44 = vperm.slane %v4494_v4, 1  ;;  %v2808_v4 = vmul.f32 %v2620_v49, %v2674_v37 }
  0xd7   : > { %4392 = vst [vmem:[#allocation172_spill] sm:$0xff] %v2556_v9  ;;  %v2634_v59 = vperm.slane %v4414_v41, 0  ;;  %v4416_v16 = vmov %v4414_v41  ;;  %v2654_v41 = vperm.slane %v4424_v30, 1  ;;  %v2718_v9 = vld [vmem:[#allocation8 + $0x50] sm:$0xff] }
  0xd8   : > { %4393 = vst [vmem:[#allocation173_spill] sm:$0xff] %v2560_v3  ;;  %v2638_v10 = vperm.slane %v4416_v16, 1  ;;  %v2658_v16 = vperm.slane %v4426_v34, 0  ;;  %v2716_v3 = vld [vmem:[#allocation8 + $0x48] sm:$0xff] }
  0xd9   : > { %4394 = vst [vmem:[#allocation174_spill] sm:$0xff] %v2564_v20  ;;  %v2714_v20 = vld [vmem:[#allocation8 + $0x40] sm:$0xff] }
  0xda   : > { %4395 = vst [vmem:[#allocation175_spill] sm:$0xff] %v2568_v50 }
  0xdb   : > { %4396 = vst [vmem:[#allocation176_spill] sm:$0xff] %v2570_v39 }
  0xdc   : > { %4397 = vst [vmem:[#allocation177_spill] sm:$0xff] %v2572_v24  ;;  %v2650_v24 = vperm.slane %v4422_v21, 0  ;;  %v2670_v21 = vmul.f32 %v2603_v0, %v2605_v12 }
  0xdd   : > { %4398 = vst [vmem:[#allocation178_spill] sm:$0xff] %v2576_v18  ;;  %v4451_v18 = vld [vmem:[#allocation26_spill] sm:$0xff] }
  0xde   : > { %4399 = vst [vmem:[#allocation179_spill] sm:$0xff] %v2580_v31  ;;  %v2709_v50 = vperm.slane %v4451_v18, 0 }
  0xdf   : > { %4400 = vst [vmem:[#allocation180_spill] sm:$0xff] %v2584_v22  ;;  %v2696_v22 = vld [vmem:[#allocation8 + $0x30] sm:$0xff] }
  0xe0   : > { %4401 = vst [vmem:[#allocation181_spill] sm:$0xff] %v2588_v11  ;;  %v2694_v11 = vld [vmem:[#allocation8 + $0x28] sm:$0xff] }
  0xe1   : > { %4402 = vst [vmem:[#allocation182_spill] sm:$0xff] %v2592_v27  ;;  %v2692_v27 = vld [vmem:[#allocation8 + $0x20] sm:$0xff] }
  0xe2   : > { %4403 = vst [vmem:[#allocation183_spill] sm:$0xff] %v2596_v29 }
  0xe3   : > { %4404 = vst [vmem:[#allocation184_spill] sm:$0xff] %v2600_v23  ;;  %v4437_v23 = vld [vmem:[#allocation24_spill] sm:$0xff] }
  0xe4   : > { %4405 = vst [vmem:[#allocation185_spill] sm:$0xff] %v2603_v0  ;;  %v4438_v38 = vrot.slane %v4437_v23, 6 }
  0xe5   : > { %4406 = vst [vmem:[#allocation186_spill] sm:$0xff] %v2605_v12  ;;  %v2690_v12 = vmul.f32 %v2620_v49, %v2622_v61 }
  0xe6   : > { %4407 = vst [vmem:[#allocation187_spill] sm:$0xff] %v2609_v28  ;;  %v2672_v28 = vld [vmem:[#allocation8 + $0x10] sm:$0xff]  ;;  %v4440_v29 = vmov %v4438_v38 }
  0xe7   : > { %4408 = vst [vmem:[#allocation188_spill] sm:$0xff] %v2613_v25  ;;  %v4420_v25 = vmov %v4418_v46  ;;  %v2804_v63 = vmul.f32 %v2603_v0, %v2672_v28 }
  0xe8   : > { %4409 = vst [vmem:[#allocation189_spill] sm:$0xff] %v2617_v13  ;;  %v2642_v13 = vperm.slane %v4418_v46, 0  ;;  %v2646_v39 = vperm.slane %v4420_v25, 1 }
  0xe9   : > { %4410 = vst [vmem:[#allocation190_spill] sm:$0xff] %v2620_v49  ;;  %v2828_v49 = vmul.f32 %v2634_v59, %v2696_v22 }
  0xea   : > { %4411 = vst [vmem:[#allocation191_spill] sm:$0xff] %v2622_v61  ;;  %v2712_v61 = vperm.slane %v4451_v18, 1  ;;  %v2732_v18 = vperm.slane %v4464_v15, 0 }
  0xeb   : > { %4412 = vst [vmem:[#allocation192_spill] sm:$0xff] %v2626_v19  ;;  %v4430_v19 = vld [vmem:[#allocation23_spill] sm:$0xff] }
  0xec   : > { %4413 = vst [vmem:[#allocation193_spill] sm:$0xff] %v2630_v40  ;;  %v4428_v40 = vmov %v4426_v34  ;;  %v4431_v36 = vrot.slane %v4430_v19, 5  ;;  %v2698_v19 = vld [vmem:[#allocation8 + $0x38] sm:$0xff] }
  0xed   : > { %4415 = vst [vmem:[#allocation194_spill] sm:$0xff] %v2634_v59  ;;  %v2662_v46 = vperm.slane %v4428_v40, 1  ;;  %v2682_v40 = vperm.slane %v4438_v38, 0  ;;  %v2832_v0 = vmul.f32 %v2638_v10, %v2698_v19 }
  0xee   : > { %4417 = vst [vmem:[#allocation195_spill] sm:$0xff] %v2638_v10  ;;  %v2666_v25 = vperm.slane %v4431_v36, 0  ;;  %v4435_v30 = vmov %v4431_v36  ;;  %v2686_v36 = vperm.slane %v4440_v29, 1 }
  0xef   : > { %4419 = vst [vmem:[#allocation196_spill] sm:$0xff] %v2642_v13  ;;  %v2678_v34 = vperm.slane %v4435_v30, 1  ;;  %v4446_v30 = vld [vmem:[#allocation25_spill] sm:$0xff] }
  0xf0   : > { %4421 = vst [vmem:[#allocation197_spill] sm:$0xff] %v2646_v39  ;;  %v4447_v31 = vrot.slane %v4446_v30, 7 }
  0xf1   : > { %4423 = vst [vmem:[#allocation198_spill] sm:$0xff] %v2650_v24 }
  0xf2   : > { %4425 = vst [vmem:[#allocation199_spill] sm:$0xff] %v2654_v41  ;;  %v2702_v38 = vperm.slane %v4447_v31, 0  ;;  %v4449_v23 = vmov %v4447_v31  ;;  %v4458_v31 = vld [vmem:[#allocation27_spill] sm:$0xff] }
  0xf3   : > { %4427 = vst [vmem:[#allocation200_spill] sm:$0xff] %v2658_v16  ;;  %v2706_v29 = vperm.slane %v4449_v23, 1  ;;  %v4459_v6 = vrot.slane %v4458_v31, 1  ;;  %v4473_v31 = vrot.slane %v4472_v54, 3  ;;  %v4487_v54 = vrot.slane %v4486_v17, 5 }
  0xf4   : > { %4429 = vst [vmem:[#allocation201_spill] sm:$0xff] %v2662_v46  ;;  %v4501_v17 = vrot.slane %v4500_v32, 7  ;;  %v2824_v32 = vmul.f32 %v2638_v10, %v2694_v11  ;;  %v2852_v10 = vmul.f32 %v2642_v13, %v2718_v9 }
  0xf5   : > { %4432 = vst [vmem:[#allocation23_spill] sm:$0xff] %v2666_v25  ;;  %v2724_v8 = vperm.slane %v4459_v6, 0  ;;  %v4461_v30 = vmov %v4459_v6  ;;  %v2744_v6 = vld [vmem:[#allocation8 + $0x78] sm:$0xff]  ;;  %v4475_v55 = vmov %v4473_v31  ;;  %v4489_v43 = vmov %v4487_v54 }
  0xf6   : > { %4433 = vst [vmem:[#allocation202_spill] sm:$0xff] %v2672_v28  ;;  %v2728_v23 = vperm.slane %v4461_v30, 1  ;;  %v2748_v30 = vperm.slane %v4473_v31, 0  ;;  %v2752_v15 = vperm.slane %v4475_v55, 1  ;;  %v2768_v31 = vld [vmem:[#allocation8 + $0x98] sm:$0xff]  ;;  %v2772_v55 = vperm.slane %v4487_v54, 0 }
  0xf7   : > { %4434 = vst [vmem:[#allocation203_spill] sm:$0xff] %v2674_v37  ;;  %v2776_v47 = vperm.slane %v4489_v43, 1  ;;  %v2792_v54 = vld [vmem:[#allocation8 + $0xb8] sm:$0xff]  ;;  %v2796_v43 = vperm.slane %v4501_v17, 0  ;;  %v4503_v33 = vmov %v4501_v17  ;;  %v2834_v37 = vld [vmem:[#allocation8 + $0xe0] sm:$0xff]  ;;  %v2836_v28 = vld [vmem:[#allocation8 + $0xe8] sm:$0xff] }
  0xf8   : > { %4436 = vst [vmem:[#allocation204_spill] sm:$0xff] %v2678_v34  ;;  %v2800_v1 = vperm.slane %v4503_v33, 1  ;;  %v2816_v17 = vld [vmem:[#allocation8 + $0xd8] sm:$0xff]  ;;  %v2820_v33 = vmul.f32 %v2634_v59, %v2692_v27  ;;  %v2848_v59 = vmul.f32 %v2646_v39, %v2716_v3 }
  0xf9   : > { %4439 = vst [vmem:[#allocation24_spill] sm:$0xff] %v2682_v40 }
  0xfa   : > { %4441 = vst [vmem:[#allocation205_spill] sm:$0xff] %v2686_v36 }
  0xfb   : > { %4442 = vst [vmem:[#allocation206_spill] sm:$0xff] %v2692_v27  ;;  %v2840_v27 = vld [vmem:[#allocation8 + $0xf8] sm:$0xff] }
  0xfc   : > { %4443 = vst [vmem:[#allocation207_spill] sm:$0xff] %v2694_v11  ;;  %v2844_v11 = vmul.f32 %v2642_v13, %v2714_v20  ;;  %v2872_v13 = vmul.f32 %v2654_v41, %v2740_v52 }
  0xfd   : > { %4444 = vst [vmem:[#allocation208_spill] sm:$0xff] %v2696_v22  ;;  %v2858_v22 = vld [vmem:[#allocation8 + $0x100] sm:$0xff] }
  0xfe   : > { %4445 = vst [vmem:[#allocation209_spill] sm:$0xff] %v2698_v19  ;;  %v2856_v19 = vmul.f32 %v2646_v39, %v2720_v42  ;;  %v2876_v39 = vmul.f32 %v2650_v24, %v2742_v53 }
  0xff   : > { %4448 = vst [vmem:[#allocation25_spill] sm:$0xff] %v2702_v38 }
 0x100   : > { %4450 = vst [vmem:[#allocation210_spill] sm:$0xff] %v2706_v29 }
 0x101   : > { %4452 = vst [vmem:[#allocation26_spill] sm:$0xff] %v2709_v50 }
 0x102   : > { %4453 = vst [vmem:[#allocation211_spill] sm:$0xff] %v2712_v61 }
 0x103   : > { %4454 = vst [vmem:[#allocation212_spill] sm:$0xff] %v2714_v20  ;;  %v2864_v20 = vld [vmem:[#allocation8 + $0x118] sm:$0xff] }
 0x104   : > { %4455 = vst [vmem:[#allocation213_spill] sm:$0xff] %v2716_v3  ;;  %v2868_v3 = vmul.f32 %v2650_v24, %v2738_v51  ;;  %v2898_v24 = vmul.f32 %v2658_v16, %v2766_v35 }
 0x105   : > { %4456 = vst [vmem:[#allocation214_spill] sm:$0xff] %v2718_v9  ;;  %v2882_v9 = vld [vmem:[#allocation8 + $0x120] sm:$0xff] }
 0x106   : > { %4457 = vst [vmem:[#allocation215_spill] sm:$0xff] %v2720_v42  ;;  %v2880_v42 = vmul.f32 %v2654_v41, %v2744_v6  ;;  %v2902_v41 = vmul.f32 %v2662_v46, %v2768_v31 }
 0x107   : > { %4460 = vst [vmem:[#allocation27_spill] sm:$0xff] %v2724_v8 }
 0x108   : > { %4462 = vst [vmem:[#allocation216_spill] sm:$0xff] %v2728_v23 }
 0x109   : > { %4465 = vst [vmem:[#allocation28_spill] sm:$0xff] %v2732_v18 }
 0x10a   : > { %4467 = vst [vmem:[#allocation217_spill] sm:$0xff] %v2736_v7 }
 0x10b   : > { %4468 = vst [vmem:[#allocation218_spill] sm:$0xff] %v2738_v51  ;;  %v2890_v51 = vmul.f32 %v2658_v16, %v2762_v26  ;;  %v2920_v16 = vmul.f32 %v2666_v25, %v2790_v48 }
 0x10c   : > { %4469 = vst [vmem:[#allocation219_spill] sm:$0xff] %v2740_v52  ;;  %v2894_v52 = vmul.f32 %v2662_v46, %v2764_v62  ;;  %v2924_v46 = vmul.f32 %v2678_v34, %v2792_v54 }
 0x10d   : > { %4470 = vst [vmem:[#allocation220_spill] sm:$0xff] %v2742_v53  ;;  %v2906_v53 = vld [vmem:[#allocation8 + $0x140] sm:$0xff] }
 0x10e   : > { %4471 = vst [vmem:[#allocation221_spill] sm:$0xff] %v2744_v6  ;;  %v2904_v6 = vld [vmem:[#allocation8 + $0x138] sm:$0xff] }
 0x10f   : > { %4474 = vst [vmem:[#allocation29_spill] sm:$0xff] %v2748_v30 }
 0x110   : > { %4476 = vst [vmem:[#allocation222_spill] sm:$0xff] %v2752_v15 }
 0x111   : > { %4479 = vst [vmem:[#allocation30_spill] sm:$0xff] %v2756_v5 }
 0x112   : > { %4481 = vst [vmem:[#allocation223_spill] sm:$0xff] %v2760_v58 }
 0x113   : > { %4482 = vst [vmem:[#allocation224_spill] sm:$0xff] %v2762_v26  ;;  %v2912_v26 = vmul.f32 %v2666_v25, %v2786_v45  ;;  %v2942_v25 = vmul.f32 %v2682_v40, %v2814_v56 }
 0x114   : > { %4483 = vst [vmem:[#allocation225_spill] sm:$0xff] %v2764_v62  ;;  %v2916_v62 = vmul.f32 %v2678_v34, %v2788_v14  ;;  %v2946_v34 = vmul.f32 %v2686_v36, %v2816_v17 }
 0x115   : > { %4484 = vst [vmem:[#allocation226_spill] sm:$0xff] %v2766_v35  ;;  %v2928_v35 = vld [vmem:[#allocation8 + $0x158] sm:$0xff] }
 0x116   : > { %4485 = vst [vmem:[#allocation227_spill] sm:$0xff] %v2768_v31  ;;  %v2926_v31 = vld [vmem:[#allocation8 + $0x150] sm:$0xff] }
 0x117   : > { %4488 = vst [vmem:[#allocation31_spill] sm:$0xff] %v2772_v55 }
 0x118   : > { %4490 = vst [vmem:[#allocation228_spill] sm:$0xff] %v2776_v47 }
 0x119   : > { %4493 = vst [vmem:[#allocation32_spill] sm:$0xff] %v2780_v57 }
 0x11a   : > { %4495 = vst [vmem:[#allocation229_spill] sm:$0xff] %v2784_v44 }
 0x11b   : > { %4496 = vst [vmem:[#allocation230_spill] sm:$0xff] %v2786_v45  ;;  %v2934_v45 = vmul.f32 %v2682_v40, %v2810_v2 }
 0x11c   : > { %4497 = vst [vmem:[#allocation231_spill] sm:$0xff] %v2788_v14  ;;  %v2938_v14 = vmul.f32 %v2686_v36, %v2812_v60  ;;  %v2968_v36 = vmul.f32 %v2706_v29, %v2840_v27 }
 0x11d   : > { %4498 = vst [vmem:[#allocation232_spill] sm:$0xff] %v2790_v48  ;;  %v2950_v48 = vld [vmem:[#allocation8 + $0x170] sm:$0xff] }
 0x11e   : > { %4499 = vst [vmem:[#allocation233_spill] sm:$0xff] %v2792_v54  ;;  %v2948_v54 = vld [vmem:[#allocation8 + $0x168] sm:$0xff] }
 0x11f   : > { %4502 = vst [vmem:[#allocation33_spill] sm:$0xff] %v2796_v43  ;;  %v2860_v43 = vld [vmem:[#allocation8 + $0x108] sm:$0xff] }
 0x120   : > { %4504 = vst [vmem:[#allocation234_spill] sm:$0xff] %v2800_v1  ;;  %v2838_v1 = vld [vmem:[#allocation8 + $0xf0] sm:$0xff] }
 0x121   : > { %4505 = vst [vmem:[#allocation235_spill] sm:$0xff] %v2810_v2  ;;  %v2956_v2 = vmul.f32 %v2702_v38, %v2834_v37  ;;  %v2964_v40 = vmul.f32 %v2702_v38, %v2838_v1 }
 0x122   : > { %4506 = vst [vmem:[#allocation236_spill] sm:$0xff] %v2812_v60  ;;  %v2960_v60 = vmul.f32 %v2706_v29, %v2836_v28  ;;  %v2990_v29 = vmul.f32 %v2712_v61, %v2864_v20 }
 0x123   : > { %4507 = vst [vmem:[#allocation237_spill] sm:$0xff] %v2814_v56  ;;  %v2972_v56 = vld [vmem:[#allocation8 + $0x188] sm:$0xff] }
 0x124   : > { %4508 = vst [vmem:[#allocation238_spill] sm:$0xff] %v2816_v17  ;;  %v2970_v17 = vld [vmem:[#allocation8 + $0x180] sm:$0xff] }
 0x125   : > { %4509 = vst [vmem:[#allocation239_spill] sm:$0xff] %v2832_v0  ;;  %v2862_v0 = vld [vmem:[#allocation8 + $0x110] sm:$0xff] }
 0x126   : > { %4510 = vst [vmem:[#allocation240_spill] sm:$0xff] %v2834_v37  ;;  %v2978_v37 = vmul.f32 %v2709_v50, %v2858_v22  ;;  %v2986_v38 = vmul.f32 %v2709_v50, %v2862_v0 }
 0x127   : > { %4511 = vst [vmem:[#allocation241_spill] sm:$0xff] %v2836_v28  ;;  %v2982_v28 = vmul.f32 %v2712_v61, %v2860_v43  ;;  %v3012_v61 = vmul.f32 %v2728_v23, %v2904_v6 }
 0x128   : > { %4512 = vst [vmem:[#allocation242_spill] sm:$0xff] %v2838_v1  ;;  %v2994_v1 = vld [vmem:[#allocation8 + $0x1a0] sm:$0xff] }
 0x129   : > { %4513 = vst [vmem:[#allocation243_spill] sm:$0xff] %v2840_v27  ;;  %v2992_v27 = vld [vmem:[#allocation8 + $0x198] sm:$0xff] }
 0x12a   : > { %4514 = vst [vmem:[#allocation244_spill] sm:$0xff] %v2852_v10  ;;  %v2886_v10 = vld [vmem:[#allocation8 + $0x130] sm:$0xff] }
 0x12b   : > { %4515 = vst [vmem:[#allocation245_spill] sm:$0xff] %v2856_v19  ;;  %v2884_v19 = vld [vmem:[#allocation8 + $0x128] sm:$0xff]  ;;  %v3008_v50 = vmul.f32 %v2724_v8, %v2886_v10 }
 0x12c   : > { %4516 = vst [vmem:[#allocation246_spill] sm:$0xff] %v2858_v22  ;;  %v3000_v22 = vmul.f32 %v2724_v8, %v2882_v9  ;;  %v3030_v8 = vmul.f32 %v2732_v18, %v2926_v31 }
 0x12d   : > { %4517 = vst [vmem:[#allocation247_spill] sm:$0xff] %v2860_v43  ;;  %v3004_v43 = vmul.f32 %v2728_v23, %v2884_v19  ;;  %v3034_v23 = vmul.f32 %v2736_v7, %v2928_v35 }
 0x12e   : > { %4518 = vst [vmem:[#allocation248_spill] sm:$0xff] %v2862_v0  ;;  %v3016_v0 = vld [vmem:[#allocation8 + $0x1b8] sm:$0xff] }
 0x12f   : > { %4519 = vst [vmem:[#allocation249_spill] sm:$0xff] %v2864_v20  ;;  %v3014_v20 = vld [vmem:[#allocation8 + $0x1b0] sm:$0xff] }
 0x130   : > { %4520 = vst [vmem:[#allocation250_spill] sm:$0xff] %v2880_v42  ;;  %v2908_v42 = vld [vmem:[#allocation8 + $0x148] sm:$0xff] }
 0x131   : > { %4521 = vst [vmem:[#allocation251_spill] sm:$0xff] %v2882_v9  ;;  %v3022_v9 = vmul.f32 %v2732_v18, %v2906_v53  ;;  %v3052_v18 = vmul.f32 %v2748_v30, %v2950_v48 }
 0x132   : > { %4522 = vst [vmem:[#allocation252_spill] sm:$0xff] %v2884_v19  ;;  %v3026_v19 = vmul.f32 %v2736_v7, %v2908_v42 }
 0x133   : > { %4523 = vst [vmem:[#allocation253_spill] sm:$0xff] %v2886_v10  ;;  %v3038_v10 = vld [vmem:[#allocation8 + $0x1d0] sm:$0xff] }
 0x134   : > { %4524 = vst [vmem:[#allocation254_spill] sm:$0xff] %v2902_v41  ;;  %v2930_v41 = vld [vmem:[#allocation8 + $0x160] sm:$0xff] }
 0x135   : > { %4525 = vst [vmem:[#allocation255_spill] sm:$0xff] %v2904_v6  ;;  %v3036_v6 = vld [vmem:[#allocation8 + $0x1c8] sm:$0xff] }
 0x136   : > { %4526 = vst [vmem:[#allocation256_spill] sm:$0xff] %v2906_v53  ;;  %v3044_v53 = vmul.f32 %v2748_v30, %v2930_v41  ;;  %v3072_v30 = vmul.f32 %v2760_v58, %v2992_v27 }
 0x137   : > { %4527 = vst [vmem:[#allocation257_spill] sm:$0xff] %v2908_v42  ;;  %v3048_v42 = vmul.f32 %v2752_v15, %v2948_v54 }
 0x138   : > { %4528 = vst [vmem:[#allocation258_spill] sm:$0xff] %v2924_v46  ;;  %v2952_v46 = vld [vmem:[#allocation8 + $0x178] sm:$0xff] }
 0x139   : > { %4529 = vst [vmem:[#allocation259_spill] sm:$0xff] %v2926_v31  ;;  %v3056_v7 = vmul.f32 %v2752_v15, %v2952_v46  ;;  %v3076_v15 = vmul.f32 %v2772_v55, %v2994_v1  ;;  %v4564_v31 = vld [vmem:[#allocation51_spill] sm:$0xff] }
 0x13a   : > { %4530 = vst [vmem:[#allocation260_spill] sm:$0xff] %v2928_v35  ;;  %v3060_v35 = vmul.f32 %v2756_v5, %v2970_v17 }
 0x13b   : > { %4531 = vst [vmem:[#allocation261_spill] sm:$0xff] %v2930_v41  ;;  %v3064_v41 = vmul.f32 %v2760_v58, %v2972_v56  ;;  %v3092_v58 = vld [vmem:[#allocation8 + $0x1e8] sm:$0xff] }
 0x13c   : > { %4532 = vst [vmem:[#allocation262_spill] sm:$0xff] %v2946_v34  ;;  %v2974_v34 = vld [vmem:[#allocation8 + $0x190] sm:$0xff] }
 0x13d   : > { %4533 = vst [vmem:[#allocation263_spill] sm:$0xff] %v2948_v54  ;;  %v3068_v54 = vmul.f32 %v2756_v5, %v2974_v34  ;;  %v3088_v5 = vmul.f32 %v2776_v47, %v3016_v0 }
 0x13e   : > { %4534 = vst [vmem:[#allocation264_spill] sm:$0xff] %v2950_v48 }
 0x13f   : > { %4535 = vst [vmem:[#allocation265_spill] sm:$0xff] %v2952_v46 }
 0x140   : > { %4536 = vst [vmem:[#allocation266_spill] sm:$0xff] %v2968_v36  ;;  %v2996_v36 = vld [vmem:[#allocation8 + $0x1a8] sm:$0xff] }
 0x141   : > { %4537 = vst [vmem:[#allocation267_spill] sm:$0xff] %v2970_v17  ;;  %v3080_v17 = vmul.f32 %v2776_v47, %v2996_v36 }
 0x142   : > { %4538 = vst [vmem:[#allocation268_spill] sm:$0xff] %v2972_v56  ;;  %v3084_v56 = vmul.f32 %v2772_v55, %v3014_v20  ;;  %v3106_v55 = vmul.f32 %v2780_v57, %v3038_v10 }
 0x143   : > { %4539 = vst [vmem:[#allocation269_spill] sm:$0xff] %v2974_v34  ;;  %v3090_v34 = vld [vmem:[#allocation8 + $0x1e0] sm:$0xff] }
 0x144   : > { %4540 = vst [vmem:[#allocation270_spill] sm:$0xff] %v2990_v29  ;;  %v3018_v29 = vld [vmem:[#allocation8 + $0x1c0] sm:$0xff] }
 0x145   : > { %4541 = vst [vmem:[#allocation271_spill] sm:$0xff] %v2992_v27  ;;  %v3094_v27 = vld [vmem:[#allocation8 + $0x1f0] sm:$0xff] }
 0x146   : > { %4542 = vst [vmem:[#allocation272_spill] sm:$0xff] %v2994_v1  ;;  %v3098_v1 = vmul.f32 %v2780_v57, %v3018_v29  ;;  %v4566_v57 = vld [vmem:[#allocation58_spill] sm:$0xff] }
 0x147   : > { %4543 = vst [vmem:[#allocation273_spill] sm:$0xff] %v2996_v36  ;;  %v3102_v36 = vmul.f32 %v2784_v44, %v3036_v6 }
 0x148   : > { %4544 = vst [vmem:[#allocation274_spill] sm:$0xff] %v3012_v61  ;;  %v3040_v61 = vld [vmem:[#allocation8 + $0x1d8] sm:$0xff] }
 0x149   : > { %4545 = vst [vmem:[#allocation275_spill] sm:$0xff] %v3014_v20  ;;  %v3110_v47 = vmul.f32 %v2784_v44, %v3040_v61  ;;  %v4562_v20 = vld [vmem:[#allocation41_spill] sm:$0xff] }
 0x14a   : > { %4546 = vst [vmem:[#allocation276_spill] sm:$0xff] %v3016_v0  ;;  %v3112_v0 = vld [vmem:[#allocation8 + $0x1f8] sm:$0xff]  ;;  %v849_v46 = vsub.f32 %v4562_v20, %v2670_v21  ;;  %v4567_v44 = vld [vmem:[#allocation73_spill] sm:$0xff] }
 0x14b   : > { %4547 = vst [vmem:[#allocation277_spill] sm:$0xff] %v3018_v29  ;;  %v4563_v29 = vld [vmem:[#allocation46_spill] sm:$0xff]  ;;  %v4570_v20 = vld [vmem:[#allocation89_spill] sm:$0xff] }
 0x14c   : > { %4548 = vst [vmem:[#allocation278_spill] sm:$0xff] %v3036_v6  ;;  %v850_v48 = vsub.f32 %v4563_v29, %v2690_v12  ;;  %v851_v6 = vsub.f32 %v4564_v31, %v2804_v63  ;;  %v4571_v12 = vld [vmem:[#allocation33_spill] sm:$0xff]  ;;  %v4573_v31 = vld [vmem:[#allocation234_spill] sm:$0xff] }
 0x14d   : > { %4549 = vst [vmem:[#allocation279_spill] sm:$0xff] %v3038_v10  ;;  %v852_v10 = vsub.f32 %v4566_v57, %v2808_v4  ;;  %v3132_v29 = vmul.f32 %v4571_v12, %v3090_v34  ;;  %v3136_v63 = vmul.f32 %v4573_v31, %v3092_v58  ;;  %v4579_v4 = vld [vmem:[#allocation244_spill] sm:$0xff] }
 0x14e   : > { %4550 = vst [vmem:[#allocation280_spill] sm:$0xff] %v3040_v61  ;;  %v854_v61 = vsub.f32 %v4567_v44, %v2824_v32  ;;  %v4576_v44 = vld [vmem:[#allocation97_spill] sm:$0xff] }
 0x14f   : > { %4551 = vst [vmem:[#allocation281_spill] sm:$0xff] %v3080_v17  ;;  %v857_v57 = vsub.f32 %v4576_v44, %v2844_v11  ;;  %v4585_v11 = vld [vmem:[#allocation111_spill] sm:$0xff] }
 0x150   : > { %4552 = vst [vmem:[#allocation282_spill] sm:$0xff] %v3084_v56  ;;  %v863_v44 = vsub.f32 %v4585_v11, %v2876_v39  ;;  %v4592_v17 = vld [vmem:[#allocation119_spill] sm:$0xff] }
 0x151   : > { %4553 = vst [vmem:[#allocation283_spill] sm:$0xff] %v3088_v5  ;;  %v4569_v5 = vld [vmem:[#allocation239_spill] sm:$0xff] }
 0x152   : > { %4554 = vst [vmem:[#allocation284_spill] sm:$0xff] %v3090_v34  ;;  %v856_v21 = vsub.f32 %v4570_v20, %v4569_v5  ;;  %v4578_v5 = vld [vmem:[#allocation103_spill] sm:$0xff]  ;;  %v4581_v20 = vld [vmem:[#allocation245_spill] sm:$0xff] }
 0x153   : > { %4555 = vst [vmem:[#allocation285_spill] sm:$0xff] %v3092_v58  ;;  %v4582_v58 = vld [vmem:[#allocation105_spill] sm:$0xff] }
 0x154   : > { %4556 = vst [vmem:[#allocation286_spill] sm:$0xff] %v3094_v27  ;;  %v860_v34 = vsub.f32 %v4582_v58, %v4581_v20  ;;  %v958_v56 = vadd.f32 %v856_v21, %v852_v10  ;;  %v4589_v58 = vld [vmem:[#allocation117_spill] sm:$0xff]  ;;  %v4594_v10 = vld [vmem:[#allocation124_spill] sm:$0xff]  ;;  %v4597_v21 = vld [vmem:[#allocation126_spill] sm:$0xff] }
 0x155   : > { %4557 = vst [vmem:[#allocation287_spill] sm:$0xff] %v3098_v1  ;;  %v866_v20 = vsub.f32 %v4589_v58, %v2894_v52 }
 0x156   : > { %4558 = vst [vmem:[#allocation288_spill] sm:$0xff] %v3102_v36  ;;  %v4565_v36 = vld [vmem:[#allocation65_spill] sm:$0xff]  ;;  %v959_v11 = vadd.f32 %v958_v56, %v860_v34  ;;  %v4599_v56 = vld [vmem:[#allocation131_spill] sm:$0xff] }
 0x157   : > { %4559 = vst [vmem:[#allocation289_spill] sm:$0xff] %v3106_v55  ;;  %v853_v1 = vsub.f32 %v4565_v36, %v2820_v33  ;;  %v3140_v36 = vmul.f32 %v4571_v12, %v3094_v27  ;;  %v4580_v33 = vld [vmem:[#allocation104_spill] sm:$0xff]  ;;  %v4584_v27 = vld [vmem:[#allocation110_spill] sm:$0xff]  ;;  %v874_v34 = vsub.f32 %v4599_v56, %v2938_v14 }
 0x158   : > { %4560 = vst [vmem:[#allocation290_spill] sm:$0xff] %v3110_v47  ;;  %v4568_v47 = vld [vmem:[#allocation81_spill] sm:$0xff]  ;;  %v859_v32 = vsub.f32 %v4580_v33, %v4579_v4  ;;  %v4588_v4 = vld [vmem:[#allocation116_spill] sm:$0xff] }
 0x159   : > { %4561 = vst [vmem:[#allocation291_spill] sm:$0xff] %v3112_v0  ;;  %v855_v55 = vsub.f32 %v4568_v47, %v2828_v49  ;;  %v3146_v49 = vmul.f32 %v4573_v31, %v3112_v0  ;;  %v858_v47 = vsub.f32 %v4578_v5, %v2848_v59  ;;  %v913_v31 = vadd.f32 %v853_v1, %v849_v46  ;;  %v4586_v0 = vld [vmem:[#allocation250_spill] sm:$0xff] }
 0x15a   : > { %4572 = vst [vmem:[#allocation41_spill] sm:$0xff] %v3132_v29  ;;  %v928_v59 = vadd.f32 %v854_v61, %v850_v48  ;;  %v865_v33 = vsub.f32 %v4588_v4, %v2890_v51  ;;  %v4593_v48 = vld [vmem:[#allocation123_spill] sm:$0xff]  ;;  %v870_v61 = vsub.f32 %v4594_v10, %v2916_v62  ;;  %v4595_v51 = vld [vmem:[#allocation125_spill] sm:$0xff] }
 0x15b   : > { %4574 = vst [vmem:[#allocation46_spill] sm:$0xff] %v3136_v63  ;;  %v4583_v63 = vld [vmem:[#allocation109_spill] sm:$0xff]  ;;  %v943_v5 = vadd.f32 %v855_v55, %v851_v6  ;;  %v871_v6 = vsub.f32 %v4595_v51, %v2920_v16  ;;  %v4596_v55 = vld [vmem:[#allocation258_spill] sm:$0xff] }
 0x15c   : > { %4575 = vst [vmem:[#allocation51_spill] sm:$0xff] %v3140_v36  ;;  %v861_v12 = vsub.f32 %v4583_v63, %v2868_v3  ;;  %v862_v36 = vsub.f32 %v4584_v27, %v2872_v13  ;;  %v4590_v3 = vld [vmem:[#allocation118_spill] sm:$0xff]  ;;  %v914_v13 = vadd.f32 %v913_v31, %v857_v57  ;;  %v929_v46 = vadd.f32 %v928_v59, %v858_v47 }
 0x15d   : > { %4577 = vst [vmem:[#allocation65_spill] sm:$0xff] %v3146_v49  ;;  %v4587_v49 = vld [vmem:[#allocation112_spill] sm:$0xff]  ;;  %v867_v63 = vsub.f32 %v4590_v3, %v2898_v24  ;;  %v4591_v27 = vld [vmem:[#allocation254_spill] sm:$0xff]  ;;  %v944_v1 = vadd.f32 %v943_v5, %v859_v32  ;;  %v872_v24 = vsub.f32 %v4597_v21, %v4596_v55  ;;  %v4602_v5 = vld [vmem:[#allocation133_spill] sm:$0xff] }
 0x15e   : > { %v864_v29 = vsub.f32 %v4587_v49, %v4586_v0  ;;  %v868_v39 = vsub.f32 %v4592_v17, %v4591_v27  ;;  %v869_v0 = vsub.f32 %v4593_v48, %v2912_v26  ;;  %v915_v52 = vadd.f32 %v914_v13, %v861_v12  ;;  %v4598_v17 = vld [vmem:[#allocation130_spill] sm:$0xff]  ;;  %v4600_v26 = vld [vmem:[#allocation132_spill] sm:$0xff] }
 0x15f   : > { %v930_v31 = vadd.f32 %v929_v46, %v862_v36  ;;  %v945_v57 = vadd.f32 %v944_v1, %v863_v44  ;;  %v873_v47 = vsub.f32 %v4598_v17, %v2934_v45  ;;  %v875_v32 = vsub.f32 %v4600_v26, %v2942_v25  ;;  %v4601_v59 = vld [vmem:[#allocation262_spill] sm:$0xff]  ;;  %v4603_v36 = vld [vmem:[#allocation137_spill] sm:$0xff]  ;;  %v4605_v45 = vld [vmem:[#allocation139_spill] sm:$0xff] }
 0x160   : > { %v960_v49 = vadd.f32 %v959_v11, %v864_v29  ;;  %v916_v62 = vadd.f32 %v915_v52, %v865_v33  ;;  %v876_v16 = vsub.f32 %v4602_v5, %v4601_v59  ;;  %v877_v44 = vsub.f32 %v4603_v36, %v2956_v2  ;;  %v4604_v29 = vld [vmem:[#allocation138_spill] sm:$0xff]  ;;  %v4607_v46 = vld [vmem:[#allocation140_spill] sm:$0xff]  ;;  %v4612_v52 = vld [vmem:[#allocation147_spill] sm:$0xff] }
 0x161   : > { %v931_v12 = vadd.f32 %v930_v31, %v866_v20  ;;  %v946_v4 = vadd.f32 %v945_v57, %v867_v63  ;;  %v878_v3 = vsub.f32 %v4604_v29, %v2960_v60  ;;  %v879_v13 = vsub.f32 %v4605_v45, %v2964_v40  ;;  %v4606_v27 = vld [vmem:[#allocation266_spill] sm:$0xff]  ;;  %v4608_v20 = vld [vmem:[#allocation144_spill] sm:$0xff]  ;;  %v4622_v36 = vld [vmem:[#allocation165_spill] sm:$0xff] }
 0x162   : > { %v961_v58 = vadd.f32 %v960_v49, %v868_v39  ;;  %v917_v14 = vadd.f32 %v916_v62, %v869_v0  ;;  %v880_v25 = vsub.f32 %v4607_v46, %v4606_v27  ;;  %v881_v63 = vsub.f32 %v4608_v20, %v2978_v37  ;;  %v4609_v39 = vld [vmem:[#allocation145_spill] sm:$0xff]  ;;  %v4610_v2 = vld [vmem:[#allocation146_spill] sm:$0xff]  ;;  %v4619_v62 = vld [vmem:[#allocation159_spill] sm:$0xff] }
 0x163   : > { %v932_v33 = vadd.f32 %v931_v12, %v870_v61  ;;  %v947_v1 = vadd.f32 %v946_v4, %v871_v6  ;;  %v882_v48 = vsub.f32 %v4609_v39, %v2982_v28  ;;  %v883_v10 = vsub.f32 %v4610_v2, %v2986_v38  ;;  %v4611_v51 = vld [vmem:[#allocation270_spill] sm:$0xff]  ;;  %v4613_v61 = vld [vmem:[#allocation151_spill] sm:$0xff]  ;;  %v4615_v37 = vld [vmem:[#allocation153_spill] sm:$0xff] }
 0x164   : > { %v962_v11 = vadd.f32 %v961_v58, %v872_v24  ;;  %v918_v60 = vadd.f32 %v917_v14, %v873_v47  ;;  %v884_v40 = vsub.f32 %v4612_v52, %v4611_v51  ;;  %v885_v6 = vsub.f32 %v4613_v61, %v3000_v22  ;;  %v4614_v24 = vld [vmem:[#allocation152_spill] sm:$0xff]  ;;  %v4616_v49 = vld [vmem:[#allocation274_spill] sm:$0xff] }
 0x165   : > { %v933_v0 = vadd.f32 %v932_v33, %v874_v34  ;;  %v948_v55 = vadd.f32 %v947_v1, %v875_v32  ;;  %v886_v31 = vsub.f32 %v4614_v24, %v3004_v43  ;;  %v887_v57 = vsub.f32 %v4615_v37, %v3008_v50  ;;  %v4617_v17 = vld [vmem:[#allocation154_spill] sm:$0xff]  ;;  %v4620_v22 = vld [vmem:[#allocation160_spill] sm:$0xff]  ;;  %v4627_v33 = vld [vmem:[#allocation173_spill] sm:$0xff] }
 0x166   : > { %v963_v21 = vadd.f32 %v962_v11, %v876_v16  ;;  %v919_v28 = vadd.f32 %v918_v60, %v877_v44  ;;  %v888_v38 = vsub.f32 %v4617_v17, %v4616_v49  ;;  %v4618_v34 = vld [vmem:[#allocation158_spill] sm:$0xff]  ;;  %v890_v59 = vsub.f32 %v4619_v62, %v3026_v19  ;;  %v4621_v16 = vld [vmem:[#allocation161_spill] sm:$0xff]  ;;  %v4632_v60 = vld [vmem:[#allocation179_spill] sm:$0xff] }
 0x167   : > { %v934_v47 = vadd.f32 %v933_v0, %v878_v3  ;;  %v949_v56 = vadd.f32 %v948_v55, %v879_v13  ;;  %v889_v32 = vsub.f32 %v4618_v34, %v3022_v9  ;;  %v891_v5 = vsub.f32 %v4620_v22, %v3030_v8  ;;  %v4623_v29 = vld [vmem:[#allocation166_spill] sm:$0xff]  ;;  %v4624_v9 = vld [vmem:[#allocation167_spill] sm:$0xff]  ;;  %v4625_v13 = vld [vmem:[#allocation168_spill] sm:$0xff] }
 0x168   : > { %v964_v26 = vadd.f32 %v963_v21, %v880_v25  ;;  %v920_v43 = vadd.f32 %v919_v28, %v881_v63  ;;  %v892_v50 = vsub.f32 %v4621_v16, %v3034_v23  ;;  %v893_v44 = vsub.f32 %v4622_v36, %v3044_v53  ;;  %v4626_v23 = vld [vmem:[#allocation172_spill] sm:$0xff]  ;;  %v4628_v1 = vld [vmem:[#allocation174_spill] sm:$0xff]  ;;  %v4635_v0 = vld [vmem:[#allocation283_spill] sm:$0xff] }
 0x169   : > { %v935_v12 = vadd.f32 %v934_v47, %v882_v48  ;;  %v950_v4 = vadd.f32 %v949_v56, %v883_v10  ;;  %v894_v3 = vsub.f32 %v4623_v29, %v3048_v42  ;;  %v895_v45 = vsub.f32 %v4624_v9, %v3052_v18  ;;  %v4629_v18 = vld [vmem:[#allocation175_spill] sm:$0xff]  ;;  %v4630_v48 = vld [vmem:[#allocation178_spill] sm:$0xff]  ;;  %v4631_v10 = vld [vmem:[#allocation281_spill] sm:$0xff] }
 0x16a   : > { %v965_v58 = vadd.f32 %v964_v26, %v884_v40  ;;  %v921_v19 = vadd.f32 %v920_v43, %v885_v6  ;;  %v896_v8 = vsub.f32 %v4625_v13, %v3056_v7  ;;  %v897_v25 = vsub.f32 %v4626_v23, %v3060_v35  ;;  %v4633_v51 = vld [vmem:[#allocation282_spill] sm:$0xff]  ;;  %v4634_v52 = vld [vmem:[#allocation180_spill] sm:$0xff]  ;;  %v4636_v55 = vld [vmem:[#allocation181_spill] sm:$0xff] }
 0x16b   : > { %v936_v14 = vadd.f32 %v935_v12, %v886_v31  ;;  %v951_v27 = vadd.f32 %v950_v4, %v887_v57  ;;  %v898_v53 = vsub.f32 %v4627_v33, %v3064_v41  ;;  %v899_v42 = vsub.f32 %v4628_v1, %v3068_v54  ;;  %v4637_v6 = vld [vmem:[#allocation287_spill] sm:$0xff]  ;;  %v4638_v24 = vld [vmem:[#allocation182_spill] sm:$0xff]  ;;  %v4639_v37 = vld [vmem:[#allocation288_spill] sm:$0xff] }
 0x16c   : > { %v966_v46 = vadd.f32 %v965_v58, %v888_v38  ;;  %v922_v11 = vadd.f32 %v921_v19, %v889_v32  ;;  %v900_v20 = vsub.f32 %v4629_v18, %v3072_v30  ;;  %v901_v2 = vsub.f32 %v4630_v48, %v3076_v15  ;;  %v4640_v15 = vld [vmem:[#allocation183_spill] sm:$0xff]  ;;  %v4641_v28 = vld [vmem:[#allocation289_spill] sm:$0xff]  ;;  %v4642_v49 = vld [vmem:[#allocation184_spill] sm:$0xff] }
 0x16d   : > { %v937_v63 = vadd.f32 %v936_v14, %v890_v59  ;;  %v952_v39 = vadd.f32 %v951_v27, %v891_v5  ;;  %v902_v35 = vsub.f32 %v4632_v60, %v4631_v10  ;;  %v903_v40 = vsub.f32 %v4634_v52, %v4633_v51  ;;  %v4643_v47 = vld [vmem:[#allocation290_spill] sm:$0xff]  ;;  %v4644_v56 = vld [vmem:[#allocation187_spill] sm:$0xff]  ;;  %v4645_v59 = vld [vmem:[#allocation41_spill] sm:$0xff] }
 0x16e   : > { %v967_v7 = vadd.f32 %v966_v46, %v892_v50  ;;  %v923_v41 = vadd.f32 %v922_v11, %v893_v44  ;;  %v904_v54 = vsub.f32 %v4636_v55, %v4635_v0  ;;  %v905_v31 = vsub.f32 %v4638_v24, %v4637_v6  ;;  %v4646_v22 = vld [vmem:[#allocation188_spill] sm:$0xff]  ;;  %v4647_v43 = vld [vmem:[#allocation46_spill] sm:$0xff]  ;;  %v4648_v16 = vld [vmem:[#allocation189_spill] sm:$0xff] }
 0x16f   : > { %v938_v21 = vadd.f32 %v937_v63, %v894_v3  ;;  %v953_v61 = vadd.f32 %v952_v39, %v895_v45  ;;  %v906_v57 = vsub.f32 %v4640_v15, %v4639_v37  ;;  %v907_v17 = vsub.f32 %v4642_v49, %v4641_v28  ;;  %v4649_v12 = vld [vmem:[#allocation51_spill] sm:$0xff]  ;;  %v4650_v4 = vld [vmem:[#allocation192_spill] sm:$0xff]  ;;  %v4651_v44 = vld [vmem:[#allocation65_spill] sm:$0xff] }
 0x170   : > { %v968_v30 = vadd.f32 %v967_v7, %v896_v8  ;;  %v924_v38 = vadd.f32 %v923_v41, %v897_v25  ;;  %v908_v26 = vsub.f32 %v4644_v56, %v4643_v47  ;;  %v909_v5 = vsub.f32 %v4646_v22, %v4645_v59  ;;  %v4652_v29 = vld [vmem:[#allocation193_spill] sm:$0xff]  ;;  %v4653_v8 = vld [vmem:[#allocation186_spill] sm:$0xff]  ;;  %v4655_v46 = vld [vmem:[#allocation191_spill] sm:$0xff] }
 0x171   : > { %v939_v34 = vadd.f32 %v938_v21, %v898_v53  ;;  %v954_v32 = vadd.f32 %v953_v61, %v899_v42  ;;  %v910_v50 = vsub.f32 %v4648_v16, %v4647_v43  ;;  %v911_v58 = vsub.f32 %v4650_v4, %v4649_v12  ;;  %v4654_v14 = vld [vmem:[#allocation34_spill] sm:$0xff]  ;;  %v4656_v23 = vld [vmem:[#allocation35_spill] sm:$0xff]  ;;  %v4660_v7 = vld [vmem:[#allocation36_spill] sm:$0xff] }
 0x172   : > { %v969_v62 = vadd.f32 %v968_v30, %v900_v20  ;;  %v925_v36 = vadd.f32 %v924_v38, %v901_v2  ;;  %v912_v3 = vsub.f32 %v4652_v29, %v4651_v44  ;;  %v3268_v27 = vmul.f32 %v4654_v14, %v4653_v8  ;;  %v4657_v33 = vld [vmem:[#allocation202_spill] sm:$0xff]  ;;  %v4658_v18 = vld [vmem:[#allocation203_spill] sm:$0xff]  ;;  %v4662_v10 = vld [vmem:[#allocation37_spill] sm:$0xff] }
 0x173   : > { %v940_v9 = vadd.f32 %v939_v34, %v902_v35  ;;  %v955_v45 = vadd.f32 %v954_v32, %v903_v40  ;;  %v3272_v25 = vmul.f32 %v4656_v23, %v4655_v46  ;;  %v3276_v53 = vmul.f32 %v4654_v14, %v4657_v33  ;;  %v4659_v39 = vld [vmem:[#allocation206_spill] sm:$0xff]  ;;  %v4661_v2 = vld [vmem:[#allocation207_spill] sm:$0xff]  ;;  %v4663_v35 = vld [vmem:[#allocation208_spill] sm:$0xff] }
 0x174   : > { %v970_v19 = vadd.f32 %v969_v62, %v904_v54  ;;  %v926_v13 = vadd.f32 %v925_v36, %v905_v31  ;;  %v3280_v20 = vmul.f32 %v4656_v23, %v4658_v18  ;;  %v3286_v48 = vmul.f32 %v4660_v7, %v4659_v39  ;;  %v4664_v0 = vld [vmem:[#allocation209_spill] sm:$0xff]  ;;  %v4665_v54 = vld [vmem:[#allocation212_spill] sm:$0xff]  ;;  %v4666_v21 = vld [vmem:[#allocation38_spill] sm:$0xff] }
 0x175   : > { %v941_v1 = vadd.f32 %v940_v9, %v906_v57  ;;  %v956_v42 = vadd.f32 %v955_v45, %v907_v17  ;;  %v3290_v60 = vmul.f32 %v4662_v10, %v4661_v2  ;;  %v3294_v51 = vmul.f32 %v4660_v7, %v4663_v35  ;;  %v4667_v30 = vld [vmem:[#allocation213_spill] sm:$0xff]  ;;  %v4668_v6 = vld [vmem:[#allocation39_spill] sm:$0xff]  ;;  %v4669_v31 = vld [vmem:[#allocation214_spill] sm:$0xff] }
 0x176   : > { %v971_v11 = vadd.f32 %v970_v19, %v908_v26  ;;  %v927_v63 = vadd.f32 %v926_v13, %v909_v5  ;;  %v3298_v55 = vmul.f32 %v4662_v10, %v4664_v0  ;;  %v3302_v61 = vmul.f32 %v4666_v21, %v4665_v54  ;;  %v4670_v15 = vld [vmem:[#allocation215_spill] sm:$0xff]  ;;  %v4671_v28 = vld [vmem:[#allocation218_spill] sm:$0xff]  ;;  %v4672_v49 = vld [vmem:[#allocation40_spill] sm:$0xff] }
 0x177   : > { %v942_v52 = vadd.f32 %v941_v1, %v910_v50  ;;  %v957_v40 = vadd.f32 %v956_v42, %v911_v58  ;;  %v3306_v24 = vmul.f32 %v4668_v6, %v4667_v30  ;;  %v3310_v37 = vmul.f32 %v4666_v21, %v4669_v31  ;;  %v4673_v38 = vld [vmem:[#allocation219_spill] sm:$0xff]  ;;  %v4675_v26 = vld [vmem:[#allocation220_spill] sm:$0xff]  ;;  %v4676_v32 = vld [vmem:[#allocation221_spill] sm:$0xff] }
 0x178   : > { %v972_v41 = vadd.f32 %v971_v11, %v912_v3  ;;  %973 = vst [vmem:[%s363_s7] sm:$0xff] %v927_v63  ;;  %v3314_v57 = vmul.f32 %v4668_v6, %v4670_v15  ;;  %v3322_v17 = vmul.f32 %v4672_v49, %v4671_v28  ;;  %v4674_v47 = vld [vmem:[#allocation43_spill] sm:$0xff]  ;;  %v3330_v34 = vmul.f32 %v4672_v49, %v4675_v26  ;;  %v4677_v59 = vld [vmem:[#allocation224_spill] sm:$0xff]  ;;  %v4679_v43 = vld [vmem:[#allocation225_spill] sm:$0xff] }
 0x179   : > { %974 = vst [vmem:[%s363_s7 + $0x8] sm:$0xff] %v942_v52  ;;  %v3326_v56 = vmul.f32 %v4674_v47, %v4673_v38  ;;  %v3334_v62 = vmul.f32 %v4674_v47, %v4676_v32  ;;  %v4678_v22 = vld [vmem:[#allocation44_spill] sm:$0xff]  ;;  %v4680_v16 = vld [vmem:[#allocation45_spill] sm:$0xff]  ;;  %v4681_v12 = vld [vmem:[#allocation226_spill] sm:$0xff] }
 0x17a   : > { %975 = vst [vmem:[%s363_s7 + $0x10] sm:$0xff] %v957_v40  ;;  %v3338_v5 = vmul.f32 %v4678_v22, %v4677_v59  ;;  %v3342_v50 = vmul.f32 %v4680_v16, %v4679_v43  ;;  %v3346_v4 = vmul.f32 %v4678_v22, %v4681_v12  ;;  %v4682_v58 = vld [vmem:[#allocation227_spill] sm:$0xff]  ;;  %v4683_v44 = vld [vmem:[#allocation230_spill] sm:$0xff]  ;;  %v4684_v29 = vld [vmem:[#allocation48_spill] sm:$0xff] }
 0x17b   : > { %v3350_v36 = vmul.f32 %v4680_v16, %v4682_v58  ;;  %976 = vst [vmem:[%s363_s7 + $0x18] sm:$0xff] %v972_v41  ;;  %v3354_v3 = vmul.f32 %v4684_v29, %v4683_v44  ;;  %v4685_v9 = vld [vmem:[#allocation231_spill] sm:$0xff]  ;;  %v4686_v45 = vld [vmem:[#allocation49_spill] sm:$0xff]  ;;  %v4687_v13 = vld [vmem:[#allocation232_spill] sm:$0xff] }
 0x17c   : > { %v3358_v19 = vmul.f32 %v4686_v45, %v4685_v9  ;;  %v3362_v8 = vmul.f32 %v4684_v29, %v4687_v13  ;;  %v4688_v14 = vld [vmem:[#allocation233_spill] sm:$0xff]  ;;  %v4689_v23 = vld [vmem:[#allocation235_spill] sm:$0xff]  ;;  %v4690_v33 = vld [vmem:[#allocation50_spill] sm:$0xff] }
 0x17d   : > { %v3366_v46 = vmul.f32 %v4686_v45, %v4688_v14  ;;  %v3370_v1 = vmul.f32 %v4690_v33, %v4689_v23  ;;  %v4691_v42 = vld [vmem:[#allocation236_spill] sm:$0xff]  ;;  %v4692_v11 = vld [vmem:[#allocation55_spill] sm:$0xff]  ;;  %v4693_v63 = vld [vmem:[#allocation237_spill] sm:$0xff] }
 0x17e   : > { %v3374_v18 = vmul.f32 %v4692_v11, %v4691_v42  ;;  %v3378_v39 = vmul.f32 %v4690_v33, %v4693_v63  ;;  %v4694_v7 = vld [vmem:[#allocation238_spill] sm:$0xff] }
 0x17f   : > { %v3382_v2 = vmul.f32 %v4692_v11, %v4694_v7 }
 0x180   : > { %1726 = shalt.err (!%p1723_p0)
}
 0x181   : > { %s1831_s16 = smov 256   ;;  %s1832_s20 = smov 16   ;;  %v4695_v10 = vld [vmem:[#allocation240_spill] sm:$0xff]  ;;  %v4698_v40 = vld [vmem:[#allocation241_spill] sm:$0xff]  ;;  %v4701_v54 = vld [vmem:[#allocation242_spill] sm:$0xff] }
 0x182   : > { %1490 = dma.vmem_to_hbm [thread:$0]  (%p1948_p7), %s3316_s8, 512, %s3318_s9, %s1234_s14, %s1831_s16, %s1831_s16, %s1832_s20   ;;  %v4696_v35 = vld [vmem:[#allocation56_spill] sm:$0xff]  ;;  %v4699_v41 = vld [vmem:[#allocation57_spill] sm:$0xff]  ;;  %v4703_v30 = vld [vmem:[#allocation243_spill] sm:$0xff] }
 0x183   : > { %v3403_v52 = vmul.f32 %v4696_v35, %v4695_v10  ;;  %v3407_v0 = vmul.f32 %v4699_v41, %v4698_v40  ;;  %v3411_v21 = vmul.f32 %v4696_v35, %v4701_v54  ;;  %v3415_v6 = vmul.f32 %v4699_v41, %v4703_v30  ;;  %v4705_v31 = vld [vmem:[#allocation246_spill] sm:$0xff]  ;;  %v4708_v49 = vld [vmem:[#allocation247_spill] sm:$0xff]  ;;  %v4711_v26 = vld [vmem:[#allocation248_spill] sm:$0xff]  ;;  %s1271_s26 = scalar_lea.hbm %s3937_s5, %s1476_s24  ;;  %s370_s25 = scalar_lea.vmem [#allocation11], %s1982_s3 }
 0x184   : > { %v4706_v15 = vld [vmem:[#allocation62_spill] sm:$0xff]  ;;  %v4709_v38 = vld [vmem:[#allocation63_spill] sm:$0xff]  ;;  %v4713_v59 = vld [vmem:[#allocation249_spill] sm:$0xff]  ;;  %s1272_s30 = sshll.u32 %s370_s25, 4  ;;  %s1274_s7 = sshll.u32 %s1271_s26, 4  ;;  %s1273_s30 = int_to_ptr.vmem [resolvable:$true] %s1272_s30  ;;  %s1275_s7 = int_to_ptr.hbm [resolvable:$true] %s1274_s7 }
 0x185   : > { %4697 = vst [vmem:[#allocation58_spill] sm:$0xff] %v3403_v52  ;;  %v3419_v28 = vmul.f32 %v4706_v15, %v4705_v31  ;;  %v3423_v47 = vmul.f32 %v4709_v38, %v4708_v49  ;;  %v3427_v32 = vmul.f32 %v4706_v15, %v4711_v26  ;;  %v3431_v22 = vmul.f32 %v4709_v38, %v4713_v59  ;;  %v4715_v43 = vld [vmem:[#allocation251_spill] sm:$0xff]  ;;  %v4716_v16 = vld [vmem:[#allocation64_spill] sm:$0xff]  ;;  %v4719_v44 = vld [vmem:[#allocation70_spill] sm:$0xff]  ;;  %s1239_s21 = scalar_lea.sflag [#allocation12], %s1979_s2  ;;  %s1741_s24 = sshra.s32 %s1275_s7, 4  ;;  %s1742_s24 = int_to_ptr.hbm [resolvable:$true] %s1741_s24 }
 0x186   : > { %4700 = vst [vmem:[#allocation73_spill] sm:$0xff] %v3407_v0  ;;  %v3435_v12 = vmul.f32 %v4716_v16, %v4715_v43  ;;  %v4718_v58 = vld [vmem:[#allocation252_spill] sm:$0xff]  ;;  %v4721_v9 = vld [vmem:[#allocation253_spill] sm:$0xff]  ;;  %v4723_v13 = vld [vmem:[#allocation255_spill] sm:$0xff]  ;;  %s1743_s8 = scalar_lea.hbm %s1742_s24, 32  ;;  %s1747_s14 = scalar_lea.hbm %s3937_s5, 64 }
 0x187   : > { %4702 = vst [vmem:[#allocation81_spill] sm:$0xff] %v3411_v21  ;;  %v3439_v29 = vmul.f32 %v4719_v44, %v4718_v58  ;;  %v3443_v45 = vmul.f32 %v4716_v16, %v4721_v9  ;;  %v3447_v14 = vmul.f32 %v4719_v44, %v4723_v13  ;;  %v4725_v23 = vld [vmem:[#allocation256_spill] sm:$0xff]  ;;  %v4726_v33 = vld [vmem:[#allocation71_spill] sm:$0xff]  ;;  %v4728_v11 = vld [vmem:[#allocation257_spill] sm:$0xff]  ;;  %p1744_p3 = scmp.ne.s32.totalorder %s1742_s24, %s1743_s8  ;;  %p1748_p2 = scmp.lt.s32.totalorder %s1742_s24, %s3937_s5 }
 0x188   : > { %4704 = vst [vmem:[#allocation239_spill] sm:$0xff] %v3415_v6  ;;  %v3451_v42 = vmul.f32 %v4726_v33, %v4725_v23  ;;  %v4729_v63 = vld [vmem:[#allocation72_spill] sm:$0xff]  ;;  %v4731_v10 = vld [vmem:[#allocation259_spill] sm:$0xff]  ;;  %v4735_v54 = vld [vmem:[#allocation261_spill] sm:$0xff]  ;;  %p1749_p1 = scmp.lt.s32.totalorder %s1747_s14, %s1743_s8 }
 0x189   : > { %4707 = vst [vmem:[#allocation89_spill] sm:$0xff] %v3419_v28  ;;  %v3455_v7 = vmul.f32 %v4729_v63, %v4728_v11  ;;  %v3459_v35 = vmul.f32 %v4726_v33, %v4731_v10  ;;  %v4733_v40 = vld [vmem:[#allocation260_spill] sm:$0xff]  ;;  %v4736_v30 = vld [vmem:[#allocation78_spill] sm:$0xff]  ;;  %v4738_v15 = vld [vmem:[#allocation263_spill] sm:$0xff]  ;;  %p1745_p5 = pnand %p1744_p3, %p1948_p7 }
 0x18a   : > { %4710 = vst [vmem:[#allocation97_spill] sm:$0xff] %v3423_v47  ;;  %v3463_v41 = vmul.f32 %v4729_v63, %v4733_v40  ;;  %v3467_v31 = vmul.f32 %v4736_v30, %v4735_v54  ;;  %v4739_v49 = vld [vmem:[#allocation79_spill] sm:$0xff]  ;;  %v4741_v26 = vld [vmem:[#allocation264_spill] sm:$0xff]  ;;  %v4743_v43 = vld [vmem:[#allocation265_spill] sm:$0xff]  ;;  %p1750_p4 = por %p1749_p1, %p1748_p2 }
 0x18b   : > { %4712 = vst [vmem:[#allocation103_spill] sm:$0xff] %v3427_v32  ;;  %v3471_v38 = vmul.f32 %v4739_v49, %v4738_v15  ;;  %v3475_v59 = vmul.f32 %v4736_v30, %v4741_v26  ;;  %v3479_v16 = vmul.f32 %v4739_v49, %v4743_v43  ;;  %v4745_v58 = vld [vmem:[#allocation267_spill] sm:$0xff]  ;;  %v4746_v44 = vld [vmem:[#allocation80_spill] sm:$0xff]  ;;  %v4749_v23 = vld [vmem:[#allocation86_spill] sm:$0xff]  ;;  %p1746_p9 = pneg %p1745_p5 }
 0x18c   : > { %4714 = vst [vmem:[#allocation244_spill] sm:$0xff] %v3431_v22  ;;  %v3483_v9 = vmul.f32 %v4746_v44, %v4745_v58  ;;  %v4748_v13 = vld [vmem:[#allocation268_spill] sm:$0xff]  ;;  %v4751_v11 = vld [vmem:[#allocation269_spill] sm:$0xff]  ;;  %v4753_v10 = vld [vmem:[#allocation271_spill] sm:$0xff] }
 0x18d   : > { %4717 = vst [vmem:[#allocation104_spill] sm:$0xff] %v3435_v12  ;;  %v3487_v33 = vmul.f32 %v4749_v23, %v4748_v13  ;;  %v3491_v63 = vmul.f32 %v4746_v44, %v4751_v11  ;;  %v3495_v40 = vmul.f32 %v4749_v23, %v4753_v10  ;;  %v4755_v54 = vld [vmem:[#allocation272_spill] sm:$0xff]  ;;  %v4756_v30 = vld [vmem:[#allocation87_spill] sm:$0xff]  ;;  %v4758_v49 = vld [vmem:[#allocation273_spill] sm:$0xff]  ;;  %p1751_p8 = pnand %p1750_p4, %p1746_p9 }
 0x18e   : > { %4720 = vst [vmem:[#allocation245_spill] sm:$0xff] %v3439_v29  ;;  %v3499_v15 = vmul.f32 %v4756_v30, %v4755_v54  ;;  %v4759_v26 = vld [vmem:[#allocation88_spill] sm:$0xff]  ;;  %v4761_v58 = vld [vmem:[#allocation275_spill] sm:$0xff]  ;;  %v4765_v11 = vld [vmem:[#allocation277_spill] sm:$0xff] }
 0x18f   : > { %4722 = vst [vmem:[#allocation105_spill] sm:$0xff] %v3443_v45  ;;  %v3503_v43 = vmul.f32 %v4759_v26, %v4758_v49  ;;  %v3507_v13 = vmul.f32 %v4756_v30, %v4761_v58  ;;  %v4768_v10 = vld [vmem:[#allocation278_spill] sm:$0xff]  ;;  %v4775_v58 = vld [vmem:[#allocation47_spill] sm:$0xff]  ;;  %v4795_v12 = vld [vmem:[#allocation76_spill] sm:$0xff] }
 0x190   : > { %4724 = vst [vmem:[#allocation109_spill] sm:$0xff] %v3447_v14  ;;  %v4791_v14 = vld [vmem:[#allocation74_spill] sm:$0xff]  ;;  %v4793_v29 = vld [vmem:[#allocation75_spill] sm:$0xff]  ;;  %v4801_v28 = vld [vmem:[#allocation84_spill] sm:$0xff] }
 0x191   : > { %4727 = vst [vmem:[#allocation110_spill] sm:$0xff] %v3451_v42  ;;  %v4789_v42 = vld [vmem:[#allocation68_spill] sm:$0xff]  ;;  %v4797_v22 = vld [vmem:[#allocation82_spill] sm:$0xff]  ;;  %v4799_v47 = vld [vmem:[#allocation83_spill] sm:$0xff] }
 0x192   : > { %4730 = vst [vmem:[#allocation111_spill] sm:$0xff] %v3455_v7  ;;  %v4787_v7 = vld [vmem:[#allocation67_spill] sm:$0xff]  ;;  %v4803_v6 = vld [vmem:[#allocation90_spill] sm:$0xff]  ;;  %v4807_v52 = vld [vmem:[#allocation92_spill] sm:$0xff] }
 0x193   : > { %4732 = vst [vmem:[#allocation250_spill] sm:$0xff] %v3459_v35  ;;  %v4805_v0 = vld [vmem:[#allocation91_spill] sm:$0xff] }
 0x194   : > { %4734 = vst [vmem:[#allocation112_spill] sm:$0xff] %v3463_v41  ;;  %v4785_v41 = vld [vmem:[#allocation66_spill] sm:$0xff] }
 0x195   : > { %4737 = vst [vmem:[#allocation116_spill] sm:$0xff] %v3467_v31 }
 0x196   : > { %4740 = vst [vmem:[#allocation117_spill] sm:$0xff] %v3471_v38  ;;  %v4782_v38 = vld [vmem:[#allocation197_spill] sm:$0xff] }
 0x197   : > { %4742 = vst [vmem:[#allocation118_spill] sm:$0xff] %v3475_v59  ;;  %v4780_v59 = vld [vmem:[#allocation196_spill] sm:$0xff] }
 0x198   : > { %4744 = vst [vmem:[#allocation254_spill] sm:$0xff] %v3479_v16 }
 0x199   : > { %4747 = vst [vmem:[#allocation119_spill] sm:$0xff] %v3483_v9  ;;  %v4774_v9 = vld [vmem:[#allocation194_spill] sm:$0xff] }
 0x19a   : > { %4750 = vst [vmem:[#allocation123_spill] sm:$0xff] %v3487_v33  ;;  %v4763_v33 = vld [vmem:[#allocation276_spill] sm:$0xff] }
 0x19b   : > { %4752 = vst [vmem:[#allocation124_spill] sm:$0xff] %v3491_v63  ;;  %v3511_v44 = vmul.f32 %v4759_v26, %v4763_v33  ;;  %v4766_v63 = vld [vmem:[#allocation94_spill] sm:$0xff]  ;;  %v4777_v33 = vld [vmem:[#allocation52_spill] sm:$0xff] }
 0x19c   : > { %4754 = vst [vmem:[#allocation125_spill] sm:$0xff] %v3495_v40  ;;  %v3515_v23 = vmul.f32 %v4766_v63, %v4765_v11  ;;  %v4769_v40 = vld [vmem:[#allocation95_spill] sm:$0xff]  ;;  %v1047_v26 = vmul.f32 %v4774_v9, %v4777_v33 }
 0x19d   : > { %4757 = vst [vmem:[#allocation258_spill] sm:$0xff] %v3499_v15  ;;  %v3519_v54 = vmul.f32 %v4769_v40, %v4768_v10  ;;  %v4771_v15 = vld [vmem:[#allocation279_spill] sm:$0xff] }
 0x19e   : > { %4760 = vst [vmem:[#allocation126_spill] sm:$0xff] %v3503_v43  ;;  %v3523_v49 = vmul.f32 %v4766_v63, %v4771_v15  ;;  %v4773_v43 = vld [vmem:[#allocation42_spill] sm:$0xff]  ;;  %v4783_v63 = vld [vmem:[#allocation60_spill] sm:$0xff] }
 0x19f   : > { %4762 = vst [vmem:[#allocation130_spill] sm:$0xff] %v3507_v13  ;;  %v1045_v30 = vmul.f32 %v4774_v9, %v4773_v43  ;;  %v4776_v13 = vld [vmem:[#allocation195_spill] sm:$0xff]  ;;  %v1051_v15 = vmul.f32 %v4780_v59, %v4783_v63 }
 0x1a0   : > { %4764 = vst [vmem:[#allocation131_spill] sm:$0xff] %v3511_v44  ;;  %v1046_v16 = vmul.f32 %v4776_v13, %v4775_v58  ;;  %v4778_v44 = vld [vmem:[#allocation53_spill] sm:$0xff]  ;;  %v4786_v58 = vld [vmem:[#allocation198_spill] sm:$0xff]  ;;  %v4788_v9 = vld [vmem:[#allocation199_spill] sm:$0xff] }
 0x1a1   : > { %4767 = vst [vmem:[#allocation132_spill] sm:$0xff] %v3515_v23  ;;  %v1048_v11 = vmul.f32 %v4776_v13, %v4778_v44  ;;  %v4779_v23 = vld [vmem:[#allocation54_spill] sm:$0xff]  ;;  %v1053_v35 = vmul.f32 %v4786_v58, %v4785_v41  ;;  %v1054_v33 = vmul.f32 %v4788_v9, %v4787_v7  ;;  %v1055_v13 = vmul.f32 %v4786_v58, %v4789_v42  ;;  %v4790_v44 = vld [vmem:[#allocation69_spill] sm:$0xff]  ;;  %v4798_v7 = vld [vmem:[#allocation23_spill] sm:$0xff] }
 0x1a2   : > { %4770 = vst [vmem:[#allocation262_spill] sm:$0xff] %v3519_v54  ;;  %v1049_v10 = vmul.f32 %v4780_v59, %v4779_v23  ;;  %v4781_v54 = vld [vmem:[#allocation59_spill] sm:$0xff]  ;;  %v1056_v23 = vmul.f32 %v4788_v9, %v4790_v44  ;;  %v4794_v59 = vld [vmem:[#allocation201_spill] sm:$0xff]  ;;  %v1061_v32 = vmul.f32 %v4798_v7, %v4797_v22  ;;  %v4800_v42 = vld [vmem:[#allocation204_spill] sm:$0xff]  ;;  %v1063_v9 = vmul.f32 %v4798_v7, %v4801_v28 }
 0x1a3   : > { %4772 = vst [vmem:[#allocation133_spill] sm:$0xff] %v3523_v49  ;;  %v1050_v31 = vmul.f32 %v4782_v38, %v4781_v54  ;;  %v4784_v49 = vld [vmem:[#allocation61_spill] sm:$0xff]  ;;  %v4792_v54 = vld [vmem:[#allocation200_spill] sm:$0xff]  ;;  %v1058_v63 = vmul.f32 %v4794_v59, %v4793_v29  ;;  %v1062_v58 = vmul.f32 %v4800_v42, %v4799_v47  ;;  %v3574_v47 = vadd.f32 %v1045_v30, %v3286_v48 }
 0x1a4   : > { %v1052_v43 = vmul.f32 %v4782_v38, %v4784_v49  ;;  %v1057_v45 = vmul.f32 %v4792_v54, %v4791_v14  ;;  %v1059_v38 = vmul.f32 %v4792_v54, %v4795_v12  ;;  %v4796_v49 = vld [vmem:[#allocation77_spill] sm:$0xff]  ;;  %v4804_v29 = vld [vmem:[#allocation24_spill] sm:$0xff]  ;;  %v3577_v28 = vadd.f32 %v1046_v16, %v3290_v60 }
 0x1a5   : > { %v1060_v41 = vmul.f32 %v4794_v59, %v4796_v49  ;;  %v4802_v44 = vld [vmem:[#allocation85_spill] sm:$0xff]  ;;  %v1065_v21 = vmul.f32 %v4804_v29, %v4803_v6  ;;  %v1067_v59 = vmul.f32 %v4804_v29, %v4807_v52  ;;  %v3580_v7 = vadd.f32 %v1047_v26, %v3294_v51 }
 0x1a6   : > { %v1064_v14 = vmul.f32 %v4800_v42, %v4802_v44  ;;  %v4806_v12 = vld [vmem:[#allocation205_spill] sm:$0xff]  ;;  %v3583_v6 = vadd.f32 %v1048_v11, %v3298_v55  ;;  %v3589_v52 = vadd.f32 %v1050_v31, %v3306_v24  ;;  %v3592_v42 = vadd.f32 %v1051_v15, %v3310_v37  ;;  %v4817_v31 = vld [vmem:[#allocation286_spill] sm:$0xff]  ;;  %v4827_v44 = vld [vmem:[#allocation100_spill] sm:$0xff] }
 0x1a7   : > { %v1066_v54 = vmul.f32 %v4806_v12, %v4805_v0  ;;  %v4808_v49 = vld [vmem:[#allocation93_spill] sm:$0xff]  ;;  %v3586_v0 = vadd.f32 %v1049_v10, %v3302_v61  ;;  %v3595_v48 = vadd.f32 %v1052_v43, %v3314_v57  ;;  %v3598_v60 = vadd.f32 %v1053_v35, %v3322_v17  ;;  %v4822_v11 = vld [vmem:[#allocation190_spill] sm:$0xff] }
 0x1a8   : > { %v1068_v22 = vmul.f32 %v4806_v12, %v4808_v49  ;;  %v3601_v51 = vadd.f32 %v1054_v33, %v3326_v56  ;;  %v3604_v55 = vadd.f32 %v1055_v13, %v3330_v34  ;;  %v3607_v61 = vadd.f32 %v1056_v23, %v3334_v62  ;;  %v4814_v35 = vld [vmem:[#allocation285_spill] sm:$0xff]  ;;  %v1578_v33 = vld [vmem:[#allocation7 + $0x18] sm:$0xff] }
 0x1a9   : > { %v3610_v24 = vadd.f32 %v1057_v45, %v3338_v5  ;;  %v3613_v37 = vadd.f32 %v1058_v63, %v3342_v50  ;;  %v3616_v57 = vadd.f32 %v1059_v38, %v3346_v4  ;;  %v3619_v17 = vadd.f32 %v1060_v41, %v3350_v36  ;;  %v4809_v4 = vld [vmem:[#allocation280_spill] sm:$0xff]  ;;  %v1577_v15 = vld [vmem:[#allocation7 + $0x10] sm:$0xff]  ;;  %v4823_v23 = vld [vmem:[#allocation98_spill] sm:$0xff] }
 0x1aa   : > { %v3622_v56 = vadd.f32 %v1061_v32, %v3354_v3  ;;  %v3625_v34 = vadd.f32 %v1062_v58, %v3358_v19  ;;  %v3628_v62 = vadd.f32 %v1063_v9, %v3362_v8  ;;  %v3631_v5 = vadd.f32 %v1064_v14, %v3366_v46  ;;  %v4811_v8 = vld [vmem:[#allocation284_spill] sm:$0xff]  ;;  %v4824_v63 = vld [vmem:[#allocation25_spill] sm:$0xff]  ;;  %v4825_v41 = vld [vmem:[#allocation99_spill] sm:$0xff] }
 0x1ab   : > { %v3634_v50 = vadd.f32 %v1065_v21, %v3370_v1  ;;  %v3638_v45 = vmul.f32 %v4769_v40, %v4809_v4  ;;  %v3641_v36 = vadd.f32 %v1066_v54, %v3374_v18  ;;  %v3644_v3 = vadd.f32 %v1067_v59, %v3378_v39  ;;  %v4812_v32 = vld [vmem:[#allocation96_spill] sm:$0xff]  ;;  %v4815_v1 = vld [vmem:[#allocation102_spill] sm:$0xff]  ;;  %v1575_v18 = vld [vmem:[#allocation7] sm:$0xff] }
 0x1ac   : > { %v3647_v19 = vadd.f32 %v1068_v22, %v3382_v2  ;;  %v3651_v46 = vmul.f32 %v4812_v32, %v4811_v8  ;;  %v3655_v21 = vmul.f32 %v4815_v1, %v4814_v35  ;;  %v3659_v16 = vmul.f32 %v4812_v32, %v4817_v31  ;;  %v4819_v40 = vld [vmem:[#allocation185_spill] sm:$0xff]  ;;  %v4820_v39 = vld [vmem:[#allocation291_spill] sm:$0xff]  ;;  %v1576_v2 = vld [vmem:[#allocation7 + $0x8] sm:$0xff] }
 0x1ad   : > { %4810 = vst [vmem:[#allocation137_spill] sm:$0xff] %v3638_v45  ;;  %v1041_v30 = vmul.f32 %v1575_v18, %v4819_v40  ;;  %v3664_v26 = vmul.f32 %v4815_v1, %v4820_v39  ;;  %v1042_v10 = vmul.f32 %v1576_v2, %v4822_v11  ;;  %v1043_v43 = vmul.f32 %v1577_v15, %v4819_v40  ;;  %v4826_v58 = vld [vmem:[#allocation210_spill] sm:$0xff]  ;;  %v4828_v29 = vld [vmem:[#allocation101_spill] sm:$0xff]  ;;  %v4831_v22 = vld [vmem:[#allocation107_spill] sm:$0xff] }
 0x1ae   : > { %4813 = vst [vmem:[#allocation138_spill] sm:$0xff] %v3651_v46  ;;  %v1044_v13 = vmul.f32 %v1578_v33, %v4822_v11  ;;  %v1069_v38 = vmul.f32 %v4824_v63, %v4823_v23  ;;  %v1070_v9 = vmul.f32 %v4826_v58, %v4825_v41  ;;  %v1071_v14 = vmul.f32 %v4824_v63, %v4827_v44  ;;  %v4829_v54 = vld [vmem:[#allocation106_spill] sm:$0xff]  ;;  %v4832_v4 = vld [vmem:[#allocation211_spill] sm:$0xff]  ;;  %v4833_v32 = vld [vmem:[#allocation108_spill] sm:$0xff] }
 0x1af   : > { %4816 = vst [vmem:[#allocation139_spill] sm:$0xff] %v3655_v21  ;;  %v1072_v12 = vmul.f32 %v4826_v58, %v4828_v29  ;;  %v4830_v59 = vld [vmem:[#allocation26_spill] sm:$0xff]  ;;  %v1074_v8 = vmul.f32 %v4832_v4, %v4831_v22  ;;  %v4834_v1 = vld [vmem:[#allocation113_spill] sm:$0xff]  ;;  %v4836_v40 = vld [vmem:[#allocation27_spill] sm:$0xff]  ;;  %v1105_v63 = vadd.f32 %v1041_v30, %v3268_v27  ;;  %v1106_v44 = vadd.f32 %v1042_v10, %v3272_v25 }
 0x1b0   : > { %4818 = vst [vmem:[#allocation266_spill] sm:$0xff] %v3659_v16  ;;  %v1073_v49 = vmul.f32 %v4830_v59, %v4829_v54  ;;  %v1075_v35 = vmul.f32 %v4830_v59, %v4833_v32  ;;  %v1076_v31 = vmul.f32 %v4832_v4, %v4834_v1  ;;  %v4835_v18 = vld [vmem:[#allocation114_spill] sm:$0xff]  ;;  %v4837_v2 = vld [vmem:[#allocation115_spill] sm:$0xff]  ;;  %v4838_v11 = vld [vmem:[#allocation216_spill] sm:$0xff]  ;;  %v1107_v29 = vadd.f32 %v1043_v43, %v3276_v53 }
 0x1b1   : > { %4821 = vst [vmem:[#allocation140_spill] sm:$0xff] %v3664_v26  ;;  %v3687_v39 = vmul.f32 %v4836_v40, %v4835_v18  ;;  %v3691_v15 = vmul.f32 %v4838_v11, %v4837_v2  ;;  %v4839_v33 = vld [vmem:[#allocation120_spill] sm:$0xff]  ;;  %v4840_v41 = vld [vmem:[#allocation121_spill] sm:$0xff]  ;;  %v1108_v54 = vadd.f32 %v1044_v13, %v3280_v20  ;;  %v4841_v59 = vld [vmem:[#allocation122_spill] sm:$0xff]  ;;  %v1169_v16 = vadd.f32 %v3574_v47, %v1105_v63 }
 0x1b2   : > { %v3695_v23 = vmul.f32 %v4836_v40, %v4839_v33  ;;  %v3700_v58 = vmul.f32 %v4838_v11, %v4840_v41  ;;  %v4842_v22 = vld [vmem:[#allocation28_spill] sm:$0xff]  ;;  %v4843_v32 = vld [vmem:[#allocation127_spill] sm:$0xff]  ;;  %v4844_v1 = vld [vmem:[#allocation217_spill] sm:$0xff] }
 0x1b3   : > { %v3707_v4 = vmul.f32 %v4842_v22, %v4841_v59  ;;  %v3711_v18 = vmul.f32 %v4844_v1, %v4843_v32  ;;  %v4845_v40 = vld [vmem:[#allocation128_spill] sm:$0xff]  ;;  %v4846_v30 = vld [vmem:[#allocation129_spill] sm:$0xff]  ;;  %v4847_v25 = vld [vmem:[#allocation134_spill] sm:$0xff]  ;;  %v1170_v63 = vadd.f32 %v1169_v16, %v3586_v0 }
 0x1b4   : > { %v3715_v27 = vmul.f32 %v4842_v22, %v4845_v40  ;;  %v3719_v2 = vmul.f32 %v4844_v1, %v4846_v30  ;;  %v4848_v53 = vld [vmem:[#allocation29_spill] sm:$0xff]  ;;  %v4849_v20 = vld [vmem:[#allocation135_spill] sm:$0xff]  ;;  %v4850_v43 = vld [vmem:[#allocation222_spill] sm:$0xff] }
 0x1b5   : > { %v3723_v10 = vmul.f32 %v4848_v53, %v4847_v25  ;;  %v3727_v13 = vmul.f32 %v4850_v43, %v4849_v20  ;;  %v4851_v11 = vld [vmem:[#allocation136_spill] sm:$0xff]  ;;  %v4852_v41 = vld [vmem:[#allocation141_spill] sm:$0xff]  ;;  %v4853_v22 = vld [vmem:[#allocation142_spill] sm:$0xff]  ;;  %v1171_v16 = vadd.f32 %v1170_v63, %v3598_v60 }
 0x1b6   : > { %v3731_v33 = vmul.f32 %v4848_v53, %v4851_v11  ;;  %v3735_v59 = vmul.f32 %v4850_v43, %v4852_v41  ;;  %v4854_v32 = vld [vmem:[#allocation30_spill] sm:$0xff]  ;;  %v4855_v40 = vld [vmem:[#allocation143_spill] sm:$0xff]  ;;  %v4858_v26 = vld [vmem:[#allocation148_spill] sm:$0xff]  ;;  %v1184_v43 = vadd.f32 %v3577_v28, %v1106_v44  ;;  %v1199_v41 = vadd.f32 %v3580_v7, %v1107_v29 }
 0x1b7   : > { %v3739_v1 = vmul.f32 %v4854_v32, %v4853_v22  ;;  %v4856_v30 = vld [vmem:[#allocation223_spill] sm:$0xff]  ;;  %v3747_v20 = vmul.f32 %v4854_v32, %v4858_v26  ;;  %v4859_v53 = vld [vmem:[#allocation149_spill] sm:$0xff]  ;;  %v1214_v22 = vadd.f32 %v3583_v6, %v1108_v54  ;;  %v4860_v21 = vld [vmem:[#allocation150_spill] sm:$0xff]  ;;  %v1172_v63 = vadd.f32 %v1171_v16, %v3610_v24 }
 0x1b8   : > { %v3743_v25 = vmul.f32 %v4856_v30, %v4855_v40  ;;  %v3752_v11 = vmul.f32 %v4856_v30, %v4859_v53  ;;  %v4861_v46 = vld [vmem:[#allocation31_spill] sm:$0xff]  ;;  %v4864_v32 = vld [vmem:[#allocation156_spill] sm:$0xff]  ;;  %v4865_v30 = vld [vmem:[#allocation157_spill] sm:$0xff]  ;;  %v1185_v7 = vadd.f32 %v1184_v43, %v3589_v52  ;;  %v1200_v6 = vadd.f32 %v1199_v41, %v3592_v42 }
 0x1b9   : > { %v3759_v40 = vmul.f32 %v4861_v46, %v4860_v21  ;;  %v4862_v45 = vld [vmem:[#allocation155_spill] sm:$0xff]  ;;  %v3767_v47 = vmul.f32 %v4861_v46, %v4864_v32  ;;  %v1215_v21 = vadd.f32 %v1214_v22, %v3595_v48  ;;  %v4866_v44 = vld [vmem:[#allocation162_spill] sm:$0xff]  ;;  %v4867_v29 = vld [vmem:[#allocation32_spill] sm:$0xff] }
 0x1ba   : > { %4857 = vst [vmem:[#allocation144_spill] sm:$0xff] %v3743_v25  ;;  %v4863_v25 = vld [vmem:[#allocation228_spill] sm:$0xff]  ;;  %v4868_v54 = vld [vmem:[#allocation163_spill] sm:$0xff]  ;;  %v4869_v53 = vld [vmem:[#allocation229_spill] sm:$0xff]  ;;  %v1186_v42 = vadd.f32 %v1185_v7, %v3601_v51  ;;  %v1201_v48 = vadd.f32 %v1200_v6, %v3604_v55 }
 0x1bb   : > { %v3763_v26 = vmul.f32 %v4863_v25, %v4862_v45  ;;  %v3772_v28 = vmul.f32 %v4863_v25, %v4865_v30  ;;  %v3779_v45 = vmul.f32 %v4867_v29, %v4866_v44  ;;  %v3783_v46 = vmul.f32 %v4869_v53, %v4868_v54  ;;  %v4870_v32 = vld [vmem:[#allocation164_spill] sm:$0xff]  ;;  %v4871_v25 = vld [vmem:[#allocation169_spill] sm:$0xff]  ;;  %v4872_v41 = vld [vmem:[#allocation170_spill] sm:$0xff] }
 0x1bc   : > { %v3787_v0 = vmul.f32 %v4867_v29, %v4870_v32  ;;  %v3792_v52 = vmul.f32 %v4869_v53, %v4871_v25  ;;  %v1216_v43 = vadd.f32 %v1215_v21, %v3607_v61  ;;  %v4873_v22 = vld [vmem:[#allocation33_spill] sm:$0xff]  ;;  %v4874_v44 = vld [vmem:[#allocation171_spill] sm:$0xff]  ;;  %v4875_v54 = vld [vmem:[#allocation234_spill] sm:$0xff]  ;;  %v1187_v55 = vadd.f32 %v1186_v42, %v3613_v37 }
 0x1bd   : > { %v3799_v30 = vmul.f32 %v4873_v22, %v4872_v41  ;;  %v3803_v29 = vmul.f32 %v4875_v54, %v4874_v44  ;;  %v4877_v32 = vld [vmem:[#allocation176_spill] sm:$0xff]  ;;  %v4878_v53 = vld [vmem:[#allocation177_spill] sm:$0xff]  ;;  %v1202_v61 = vadd.f32 %v1201_v48, %v3616_v57  ;;  %v4879_v6 = vld [vmem:[#allocation58_spill] sm:$0xff] }
 0x1be   : > { %v3807_v60 = vmul.f32 %v4873_v22, %v4877_v32  ;;  %v3812_v51 = vmul.f32 %v4875_v54, %v4878_v53  ;;  %v1217_v7 = vadd.f32 %v1216_v43, %v3619_v17  ;;  %v1133_v21 = vadd.f32 %v1069_v38, %v4879_v6  ;;  %v4880_v25 = vld [vmem:[#allocation73_spill] sm:$0xff]  ;;  %v4882_v32 = vld [vmem:[#allocation239_spill] sm:$0xff]  ;;  %v4886_v53 = vld [vmem:[#allocation244_spill] sm:$0xff] }
 0x1bf   : > { %4876 = vst [vmem:[#allocation145_spill] sm:$0xff] %v3803_v29  ;;  %v1134_v41 = vadd.f32 %v1070_v9, %v4880_v25  ;;  %v4881_v44 = vld [vmem:[#allocation81_spill] sm:$0xff]  ;;  %v1173_v22 = vadd.f32 %v1172_v63, %v3622_v56  ;;  %v1136_v24 = vadd.f32 %v1072_v12, %v4882_v32  ;;  %v1188_v16 = vadd.f32 %v1187_v55, %v3625_v34  ;;  %v4885_v43 = vld [vmem:[#allocation103_spill] sm:$0xff]  ;;  %v4887_v63 = vld [vmem:[#allocation104_spill] sm:$0xff] }
 0x1c0   : > { %v1135_v29 = vadd.f32 %v1071_v14, %v4881_v44  ;;  %v1203_v54 = vadd.f32 %v1202_v61, %v3628_v62  ;;  %v1218_v37 = vadd.f32 %v1217_v7, %v3631_v5  ;;  %v4883_v42 = vld [vmem:[#allocation89_spill] sm:$0xff]  ;;  %v1139_v38 = vadd.f32 %v1075_v35, %v4885_v43  ;;  %v4891_v6 = vld [vmem:[#allocation110_spill] sm:$0xff]  ;;  %v4900_v43 = vld [vmem:[#allocation123_spill] sm:$0xff] }
 0x1c1   : > { %v1137_v57 = vadd.f32 %v1073_v49, %v4883_v42  ;;  %v4884_v48 = vld [vmem:[#allocation97_spill] sm:$0xff]  ;;  %v1174_v9 = vadd.f32 %v1173_v22, %v3634_v50  ;;  %v1140_v14 = vadd.f32 %v1076_v31, %v4886_v53  ;;  %v1189_v56 = vadd.f32 %v1188_v16, %v3641_v36  ;;  %v4894_v22 = vld [vmem:[#allocation112_spill] sm:$0xff] }
 0x1c2   : > { %v1138_v17 = vadd.f32 %v1074_v8, %v4884_v48  ;;  %v1204_v12 = vadd.f32 %v1203_v54, %v3644_v3  ;;  %v1219_v34 = vadd.f32 %v1218_v37, %v3647_v19  ;;  %v1141_v62 = vadd.f32 %v3687_v39, %v4887_v63  ;;  %v4888_v5 = vld [vmem:[#allocation245_spill] sm:$0xff]  ;;  %v4892_v19 = vld [vmem:[#allocation111_spill] sm:$0xff]  ;;  %v4893_v39 = vld [vmem:[#allocation250_spill] sm:$0xff] }
 0x1c3   : > { %v1142_v49 = vadd.f32 %v3691_v15, %v4888_v5  ;;  %v4889_v55 = vld [vmem:[#allocation105_spill] sm:$0xff]  ;;  %v1175_v35 = vadd.f32 %v1174_v9, %v1133_v21  ;;  %v1190_v31 = vadd.f32 %v1189_v56, %v1134_v41  ;;  %v1145_v3 = vadd.f32 %v3707_v4, %v4891_v6  ;;  %v4897_v4 = vld [vmem:[#allocation118_spill] sm:$0xff] }
 0x1c4   : > { %v1143_v8 = vadd.f32 %v3695_v23, %v4889_v55  ;;  %v4890_v61 = vld [vmem:[#allocation109_spill] sm:$0xff]  ;;  %v1205_v7 = vadd.f32 %v1204_v12, %v1135_v29  ;;  %v1220_v36 = vadd.f32 %v1219_v34, %v1136_v24  ;;  %v1146_v25 = vadd.f32 %v3711_v18, %v4892_v19  ;;  %v4898_v37 = vld [vmem:[#allocation254_spill] sm:$0xff] }
 0x1c5   : > { %v1144_v50 = vadd.f32 %v3700_v58, %v4890_v61  ;;  %v1147_v44 = vadd.f32 %v3715_v27, %v4893_v39  ;;  %v1176_v15 = vadd.f32 %v1175_v35, %v1137_v57  ;;  %v1148_v23 = vadd.f32 %v3719_v2, %v4894_v22  ;;  %v4895_v58 = vld [vmem:[#allocation116_spill] sm:$0xff]  ;;  %v4896_v41 = vld [vmem:[#allocation117_spill] sm:$0xff]  ;;  %v4899_v2 = vld [vmem:[#allocation119_spill] sm:$0xff] }
 0x1c6   : > { %v1191_v21 = vadd.f32 %v1190_v31, %v1138_v17  ;;  %v1206_v32 = vadd.f32 %v1205_v7, %v1139_v38  ;;  %v1221_v16 = vadd.f32 %v1220_v36, %v1140_v14  ;;  %v1149_v29 = vadd.f32 %v3723_v10, %v4895_v58  ;;  %v4901_v38 = vld [vmem:[#allocation144_spill] sm:$0xff]  ;;  %v4903_v14 = vld [vmem:[#allocation125_spill] sm:$0xff]  ;;  %v4909_v7 = vld [vmem:[#allocation262_spill] sm:$0xff] }
 0x1c7   : > { %v1150_v24 = vadd.f32 %v3727_v13, %v4896_v41  ;;  %v1151_v54 = vadd.f32 %v3731_v33, %v4897_v4  ;;  %v1177_v18 = vadd.f32 %v1176_v15, %v1141_v62  ;;  %v1152_v27 = vadd.f32 %v3735_v59, %v4898_v37  ;;  %v4902_v10 = vld [vmem:[#allocation124_spill] sm:$0xff]  ;;  %v4904_v59 = vld [vmem:[#allocation258_spill] sm:$0xff]  ;;  %v4910_v36 = vld [vmem:[#allocation133_spill] sm:$0xff] }
 0x1c8   : > { %v1192_v42 = vadd.f32 %v1191_v21, %v1142_v49  ;;  %v1207_v57 = vadd.f32 %v1206_v32, %v1143_v8  ;;  %v1222_v48 = vadd.f32 %v1221_v16, %v1144_v50  ;;  %v1153_v17 = vadd.f32 %v3739_v1, %v4899_v2  ;;  %v4905_v62 = vld [vmem:[#allocation126_spill] sm:$0xff]  ;;  %v4907_v8 = vld [vmem:[#allocation131_spill] sm:$0xff]  ;;  %v4916_v32 = vld [vmem:[#allocation140_spill] sm:$0xff] }
 0x1c9   : > { %v1154_v9 = vadd.f32 %v4901_v38, %v4900_v43  ;;  %v1155_v53 = vadd.f32 %v3747_v20, %v4902_v10  ;;  %v1178_v13 = vadd.f32 %v1177_v18, %v1145_v3  ;;  %v1156_v33 = vadd.f32 %v3752_v11, %v4903_v14  ;;  %v4906_v1 = vld [vmem:[#allocation130_spill] sm:$0xff]  ;;  %v4908_v11 = vld [vmem:[#allocation132_spill] sm:$0xff]  ;;  %v4911_v3 = vld [vmem:[#allocation137_spill] sm:$0xff] }
 0x1ca   : > { %v1193_v56 = vadd.f32 %v1192_v42, %v1146_v25  ;;  %v1208_v12 = vadd.f32 %v1207_v57, %v1147_v44  ;;  %v1223_v34 = vadd.f32 %v1222_v48, %v1148_v23  ;;  %v1157_v63 = vadd.f32 %v3759_v40, %v4904_v59  ;;  %v4912_v39 = vld [vmem:[#allocation138_spill] sm:$0xff]  ;;  %v4913_v15 = vld [vmem:[#allocation139_spill] sm:$0xff] }
 0x1cb   : > { %v1158_v5 = vadd.f32 %v3763_v26, %v4905_v62  ;;  %v1159_v49 = vadd.f32 %v3767_v47, %v4906_v1  ;;  %v1179_v55 = vadd.f32 %v1178_v13, %v1149_v29  ;;  %v1160_v20 = vadd.f32 %v3772_v28, %v4907_v8  ;;  %v4915_v23 = vld [vmem:[#allocation266_spill] sm:$0xff] }
 0x1cc   : > { %v1194_v35 = vadd.f32 %v1193_v56, %v1150_v24  ;;  %v1209_v61 = vadd.f32 %v1208_v12, %v1151_v54  ;;  %v1224_v50 = vadd.f32 %v1223_v34, %v1152_v27  ;;  %v1161_v31 = vadd.f32 %v3779_v45, %v4908_v11  ;;  %v4914_v45 = vld [vmem:[#allocation145_spill] sm:$0xff] }
 0x1cd   : > { %v1162_v40 = vadd.f32 %v3783_v46, %v4909_v7  ;;  %v1163_v26 = vadd.f32 %v3787_v0, %v4910_v36  ;;  %v1180_v6 = vadd.f32 %v1179_v55, %v1153_v17  ;;  %v1164_v47 = vadd.f32 %v3792_v52, %v4911_v3 }
 0x1ce   : > { %v1195_v19 = vadd.f32 %v1194_v35, %v1154_v9  ;;  %v1210_v25 = vadd.f32 %v1209_v61, %v1155_v53  ;;  %v1225_v28 = vadd.f32 %v1224_v50, %v1156_v33  ;;  %v1165_v44 = vadd.f32 %v3799_v30, %v4912_v39 }
 0x1cf   : > { %v1166_v22 = vadd.f32 %v4914_v45, %v4913_v15  ;;  %v1167_v46 = vadd.f32 %v3807_v60, %v4915_v23  ;;  %v1181_v21 = vadd.f32 %v1180_v6, %v1157_v63  ;;  %v1168_v0 = vadd.f32 %v3812_v51, %v4916_v32 }
 0x1d0   : > { %v1196_v16 = vadd.f32 %v1195_v19, %v1158_v5  ;;  %v1211_v58 = vadd.f32 %v1210_v25, %v1159_v49  ;;  %v1226_v52 = vadd.f32 %v1225_v28, %v1160_v20 }
 0x1d1   : > { %v1182_v29 = vadd.f32 %v1181_v21, %v1161_v31 }
 0x1d2   : > { %v1197_v30 = vadd.f32 %v1196_v16, %v1162_v40  ;;  %v1212_v41 = vadd.f32 %v1211_v58, %v1163_v26  ;;  %v1227_v24 = vadd.f32 %v1226_v52, %v1164_v47 }
 0x1d3   : > { %v1183_v4 = vadd.f32 %v1182_v29, %v1165_v44 }
 0x1d4   : > { %v1198_v60 = vadd.f32 %v1197_v30, %v1166_v22  ;;  %v1213_v51 = vadd.f32 %v1212_v41, %v1167_v46  ;;  %v1228_v54 = vadd.f32 %v1227_v24, %v1168_v0 }
 0x1d5   : > { %1229 = vst [vmem:[%s370_s25] sm:$0xff] %v1183_v4 }
 0x1d6   : > { %1230 = vst [vmem:[%s370_s25 + $0x8] sm:$0xff] %v1198_v60 }
 0x1d7   : > { %1231 = vst [vmem:[%s370_s25 + $0x10] sm:$0xff] %v1213_v51 }
 0x1d8   : > { %1232 = vst [vmem:[%s370_s25 + $0x18] sm:$0xff] %v1228_v54 }
 0x1d9   : > { %1754 = shalt.err (!%p1751_p8)
}
 0x1da   : > { %1491 = dma.vmem_to_hbm [thread:$0]  (%p1948_p7), %s1273_s30, 512, %s1275_s7, %s1239_s21, %s1831_s16, %s1831_s16, %s1832_s20  }
 0x1db PF: > { %s1289_s2 = sand.u32 1, %s1805_s18   ;;  %p1509_p10 = pnand %p1452_p11, %p1908_p6 }
 0x1dc   : > { %s1290_s17 = scalar_lea.sflag [#allocation4], %s1289_s2 }
 0x1dd   : > { %p1510_p12 = pneg %p1509_p10 }
 0x1df   : > { %1796 = dma.done.wait (%p1510_p12), %s1290_s17, 512  }
 0x1e0   : > { %1798 = vsyncadd (%p1510_p12), %s1290_s17, 4294966784  ;;  %s1300_s10 = scalar_lea.sflag [#allocation12], %s1289_s2 }
 0x1e1   : > { %1800 = dma.done.wait (%p1510_p12), %s1300_s10, 512  }
 0x1e2   : > { %1802 = vsyncadd (%p1510_p12), %s1300_s10, 4294966784  ;;  %s29_s23 = sadd.s32 1, %s1825_s23   ;;  %s4917_s28 = sld [smem:[#allocation19_spill]] }
 0x1e3   : > { %p26_p13 = scmp.ge.s32.totalorder %s29_s23, 4   ;;  %s4918_s20 = sld [smem:[#allocation22_spill]] }
 0x1e4   : > { %s4919_s21 = sld [smem:[#allocation20_spill]]  ;;  %s4921_s18 = smov %s1809_s19 }
 0x1e5   : > { %s4920_s22 = sld [smem:[#allocation21_spill]]  ;;  %28 = sbr.rel (!%p26_p13) target bundleno = 14 (0xe), region = 121 }
 0x1e8   : > { %s4922_s19 = smov %s4917_s28 }
 0x1ea   :  { %1306 = vsyncpa [#allocation3], 1 }
 0x1eb   :  { %1308 = vsyncpa [#allocation3 + $0x1], 1 }
 0x1ec   :  { %1309 = vsyncpa [#allocation6], 1 }
 0x1ed   :  { %1311 = vsyncpa [#allocation6 + $0x1], 1 }
 0x1ee   :  { %1312 = vsyncpa [#allocation9], 1 }
 0x1ef   :  { %1313 = vsyncpa [#allocation4], 1 }
 0x1f0   :  { %1315 = vsyncpa [#allocation4 + $0x1], 1 }
 0x1f1   :  { %1316 = vsyncpa [#allocation12], 1 }
 0x1f2   :  { %1318 = vsyncpa [#allocation12 + $0x1], 1 }

</bundles_post_ra>
